<compile_context>
chip_gen: v5e
topology: v5e:2x2
jax: 0.10.0
libtpu: 0.0.40
codegen_flags: <defaults>
</compile_context>

<pallas_src>
import jax
import jax.numpy as jnp
from jax import lax
from jax.experimental import pallas as pl
from jax.experimental.pallas import tpu as pltpu

EPS = 1e-12


def _layernorm(z, gamma, beta):
    mean = jnp.mean(z, axis=-1, keepdims=True)
    var = jnp.mean((z - mean) ** 2, axis=-1, keepdims=True)
    return (z - mean) * lax.rsqrt(var + EPS) * gamma + beta


def encoder_block_kernel(
    x_q_ref, x_kv_ref, bias_ref,
    wq_ref, bq_ref, wk_ref, bk_ref, wv_ref, bv_ref, wo_ref, bo_ref,
    g1_ref, be1_ref,
    w1_ref, bf1_ref, w2_ref, bf2_ref,
    g2_ref, be2_ref,
    out_ref,
):
    x_q = x_q_ref[0]             # (Tq, D) f32 -- residual path stays f32
    x_kv = x_kv_ref[0]           # (S,  D) f32 -- K/V source (full sequence)
    bias = bias_ref[0]           # (Tq, S) f32 additive mask bias {0, -1e4}

    xq_b = x_q.astype(jnp.bfloat16)
    xkv_b = x_kv.astype(jnp.bfloat16)

    n_head, _, d_head = wq_ref.shape
    scale = 1.0 / (d_head ** 0.5)
    # contract last dims of both operands: q @ k^T without an explicit transpose
    dn_qkt = (((1,), (1,)), ((), ()))

    acc = jnp.zeros(x_q.shape, jnp.float32)
    for h in range(n_head):  # static unroll; head weights are leading-axis indexed
        q_h = (jnp.dot(xq_b, wq_ref[h], preferred_element_type=jnp.float32)
               + bq_ref[h]) * scale                       # scale folded into q
        k_h = jnp.dot(xkv_b, wk_ref[h], preferred_element_type=jnp.float32) + bk_ref[h]
        v_h = jnp.dot(xkv_b, wv_ref[h], preferred_element_type=jnp.float32) + bv_ref[h]

        s = lax.dot_general(q_h.astype(jnp.bfloat16), k_h.astype(jnp.bfloat16),
                            dimension_numbers=dn_qkt,
                            preferred_element_type=jnp.float32)   # (Tq, S)
        s = s + bias
        s = s - jnp.max(s, axis=-1, keepdims=True)
        p = jnp.exp(s)
        p = p * pl.reciprocal(jnp.sum(p, axis=-1, keepdims=True), approx=True)

        ctx = jnp.dot(p.astype(jnp.bfloat16), v_h.astype(jnp.bfloat16),
                      preferred_element_type=jnp.float32)         # (Tq, dh)
        # output projection accumulated per head (replaces concat + single big matmul)
        acc = acc + jnp.dot(ctx.astype(jnp.bfloat16), wo_ref[h],
                            preferred_element_type=jnp.float32)

    attn = acc + bo_ref[0]
    # dropout_1: identity in eval mode
    y = _layernorm(x_q + attn, g1_ref[0], be1_ref[0])             # (Tq, D) f32

    # ---- feed-forward, residual, layernorm 2 ----
    # TODO(synk): for very large ffn_hidden, add an 'arbitrary' H-chunk reduction axis
    # with an f32 accumulator instead of materializing the full (Tq, H) intermediate.
    hdn = jnp.dot(y.astype(jnp.bfloat16), w1_ref[...],
                  preferred_element_type=jnp.float32) + bf1_ref[0]
    hdn = jnp.maximum(hdn, 0.0)
    # dropout inside FeedForward: identity in eval mode
    ffn = jnp.dot(hdn.astype(jnp.bfloat16), w2_ref[...],
                  preferred_element_type=jnp.float32) + bf2_ref[0]
    # dropout_2: identity in eval mode
    out_ref[0] = _layernorm(y + ffn, g2_ref[0], be2_ref[0])


def _choose_q_tile(S, target=256):
    if S <= target:
        return S
    for t in range(target, 7, -1):           # largest divisor of S, multiple of 8
        if S % t == 0 and t % 8 == 0:
            return t
    return S


def encoder_block(x, src_mask, params, n_head, q_tile=256):
    B, S, D = x.shape
    H = params["w1"].shape[1]
    d_head = D // n_head
    Tq = _choose_q_tile(S, q_tile)
    n_qt = S // Tq

    bf16, f32 = jnp.bfloat16, jnp.float32

    # Head-major weight/bias splits done once in plain JAX (outside the kernel),
    # so the kernel never slices activations along the lane axis.
    def split_in(w):   # (D, D) -> (n_head, D, d_head), bf16
        return jnp.transpose(w.reshape(D, n_head, d_head), (1, 0, 2)).astype(bf16)

    def split_bias(b):  # (1, D) -> (n_head, 1, d_head), f32
        return b.reshape(n_head, 1, d_head).astype(f32)

    wq_h, wk_h, wv_h = (split_in(params["wq"]), split_in(params["wk"]),
                        split_in(params["wv"]))
    bq_h, bk_h, bv_h = (split_bias(params["bq"]), split_bias(params["bk"]),
                        split_bias(params["bv"]))
    wo_h = params["wo"].reshape(n_head, d_head, D).astype(bf16)
    bo = params["bo"].astype(f32)

    w1 = params["w1"].astype(bf16)
    b1 = params["b1"].astype(f32)
    w2 = params["w2"].astype(bf16)
    b2 = params["b2"].astype(f32)

    # Additive mask bias computed once: (B,1,S,S) 1/0 mask -> (B,S,S) of {0, -1e4}
    mask_bias = (src_mask[:, 0].astype(f32) - 1.0) * 1e4

    wspec2 = lambda shape: pl.BlockSpec(shape, lambda b, qi: (0, 0))
    wspec3 = lambda shape: pl.BlockSpec(shape, lambda b, qi: (0, 0, 0))

    in_specs = [
        pl.BlockSpec((1, Tq, D), lambda b, qi: (b, qi, 0)),   # x (query tile)
        pl.BlockSpec((1, S, D),  lambda b, qi: (b, 0, 0)),    # x (full seq, K/V source)
        pl.BlockSpec((1, Tq, S), lambda b, qi: (b, qi, 0)),   # additive mask bias
        wspec3((n_head, D, d_head)), wspec3((n_head, 1, d_head)),   # wq, bq
        wspec3((n_head, D, d_head)), wspec3((n_head, 1, d_head)),   # wk, bk
        wspec3((n_head, D, d_head)), wspec3((n_head, 1, d_head)),   # wv, bv
        wspec3((n_head, d_head, D)), wspec2((1, D)),                # wo, bo
        wspec2((1, D)), wspec2((1, D)),                             # gamma1, beta1
        wspec2((D, H)), wspec2((1, H)),                             # w1, b1
        wspec2((H, D)), wspec2((1, D)),                             # w2, b2
        wspec2((1, D)), wspec2((1, D)),                             # gamma2, beta2
    ]

    return pl.pallas_call(
        encoder_block_kernel,
        out_shape=jax.ShapeDtypeStruct((B, S, D), f32),
        grid=(B, n_qt),
        in_specs=in_specs,
        out_specs=pl.BlockSpec((1, Tq, D), lambda b, qi: (b, qi, 0)),
        compiler_params=pltpu.CompilerParams(
            dimension_semantics=("parallel", "parallel"),
            vmem_limit_bytes=48 * 1024 * 1024,
        ),
    )(
        x.astype(f32), x.astype(f32), mask_bias,
        wq_h, bq_h, wk_h, bk_h, wv_h, bv_h, wo_h, bo,
        params["gamma1"].astype(f32), params["beta1"].astype(f32),
        w1, b1, w2, b2,
        params["gamma2"].astype(f32), params["beta2"].astype(f32),
    )


# ------------------------- pure-JAX reference (f32) -------------------------
def encoder_block_ref(x, src_mask, params, n_head):
    B, S, D = x.shape
    d_head = D // n_head
    q = x @ params["wq"] + params["bq"]
    k = x @ params["wk"] + params["bk"]
    v = x @ params["wv"] + params["bv"]

    def split(t):
        return t.reshape(B, S, n_head, d_head).transpose(0, 2, 1, 3)

    qh, kh, vh = split(q), split(k), split(v)
    scores = jnp.einsum("bhqd,bhkd->bhqk", qh, kh) / jnp.sqrt(jnp.float32(d_head))
    scores = jnp.where(src_mask[:, None, 0] == 0, -1e4, scores) if False else \
        jnp.where(src_mask == 0, -1e4, scores)
    p = jax.nn.softmax(scores, axis=-1)
    ctx = jnp.einsum("bhqk,bhkd->bhqd", p, vh).transpose(0, 2, 1, 3).reshape(B, S, D)
    attn = ctx @ params["wo"] + params["bo"]

    def ln(z, g, b_):
        m = jnp.mean(z, -1, keepdims=True)
        var = jnp.mean((z - m) ** 2, -1, keepdims=True)
        return (z - m) / jnp.sqrt(var + EPS) * g + b_

    y = ln(x + attn, params["gamma1"], params["beta1"])
    hdn = jnp.maximum(y @ params["w1"] + params["b1"], 0.0)
    ffn = hdn @ params["w2"] + params["b2"]
    return ln(y + ffn, params["gamma2"], params["beta2"])


def init_params(key, d_model, ffn_hidden):
    ks = jax.random.split(key, 8)
    scale = 0.02
    return {
        "wq": scale * jax.random.normal(ks[0], (d_model, d_model), jnp.float32),
        "bq": jnp.zeros((1, d_model), jnp.float32),
        "wk": scale * jax.random.normal(ks[1], (d_model, d_model), jnp.float32),
        "bk": jnp.zeros((1, d_model), jnp.float32),
        "wv": scale * jax.random.normal(ks[2], (d_model, d_model), jnp.float32),
        "bv": jnp.zeros((1, d_model), jnp.float32),
        "wo": scale * jax.random.normal(ks[3], (d_model, d_model), jnp.float32),
        "bo": jnp.zeros((1, d_model), jnp.float32),
        "gamma1": jnp.ones((1, d_model), jnp.float32),
        "beta1": jnp.zeros((1, d_model), jnp.float32),
        "w1": scale * jax.random.normal(ks[4], (d_model, ffn_hidden), jnp.float32),
        "b1": scale * jax.random.normal(ks[5], (1, ffn_hidden), jnp.float32),
        "w2": scale * jax.random.normal(ks[6], (ffn_hidden, d_model), jnp.float32),
        "b2": scale * jax.random.normal(ks[7], (1, d_model), jnp.float32),
        "gamma2": jnp.ones((1, d_model), jnp.float32),
        "beta2": jnp.zeros((1, d_model), jnp.float32),
    }


if __name__ == "__main__":
    B, S, D, n_head, ffn_hidden = 2, 8, 32, 4, 64

    key = jax.random.PRNGKey(0)
    kx, kp = jax.random.split(key)
    x = jax.random.normal(kx, (B, S, D), jnp.float32)

    # src_mask: (B, 1, S, S); mask out the last two key positions for batch 1
    mask = jnp.ones((B, 1, S, S), jnp.float32)
    mask = mask.at[1, :, :, S - 2:].set(0.0)

    params = init_params(kp, D, ffn_hidden)

    out = encoder_block(x, mask, params, n_head)
    out = jax.block_until_ready(out)

    ref = encoder_block_ref(x, mask, params, n_head)
    assert out.shape == (B, S, D)
    assert bool(jnp.all(jnp.isfinite(out)))
    max_err = float(jnp.max(jnp.abs(out - ref)))
    assert max_err < 5e-2, f"mismatch vs f32 reference: {max_err}"
    print("KERNEL_OK")
</pallas_src>

<mosaic_0001>
module attributes {stable_mosaic.version = 11 : i64} {
  func.func @encoder_block_kernel(%arg0: i32, %arg1: i32, %arg2: memref<1x8x32xf32, #tpu.memory_space<vmem>>, %arg3: memref<1x8x32xf32, #tpu.memory_space<vmem>>, %arg4: memref<1x8x8xf32, #tpu.memory_space<vmem>>, %arg5: memref<4x32x8xbf16, #tpu.memory_space<vmem>>, %arg6: memref<4x1x8xf32, #tpu.memory_space<vmem>>, %arg7: memref<4x32x8xbf16, #tpu.memory_space<vmem>>, %arg8: memref<4x1x8xf32, #tpu.memory_space<vmem>>, %arg9: memref<4x32x8xbf16, #tpu.memory_space<vmem>>, %arg10: memref<4x1x8xf32, #tpu.memory_space<vmem>>, %arg11: memref<4x8x32xbf16, #tpu.memory_space<vmem>>, %arg12: memref<1x32xf32, #tpu.memory_space<vmem>>, %arg13: memref<1x32xf32, #tpu.memory_space<vmem>>, %arg14: memref<1x32xf32, #tpu.memory_space<vmem>>, %arg15: memref<32x64xbf16, #tpu.memory_space<vmem>>, %arg16: memref<1x64xf32, #tpu.memory_space<vmem>>, %arg17: memref<64x32xbf16, #tpu.memory_space<vmem>>, %arg18: memref<1x32xf32, #tpu.memory_space<vmem>>, %arg19: memref<1x32xf32, #tpu.memory_space<vmem>>, %arg20: memref<1x32xf32, #tpu.memory_space<vmem>>, %arg21: memref<1x8x32xf32, #tpu.memory_space<vmem>>) attributes {dimension_semantics = [#tpu.dimension_semantics<parallel>, #tpu.dimension_semantics<parallel>], iteration_bounds = array<i64: 2, 1>, scalar_prefetch = 0 : i64, scratch_operands = 0 : i64, tpu.core_type = #tpu.core_type<tc>, window_params = [{transform_indices = @transform_0, window_bounds = array<i64: 1, 8, 32>}, {transform_indices = @transform_1, window_bounds = array<i64: 1, 8, 32>}, {transform_indices = @transform_2, window_bounds = array<i64: 1, 8, 8>}, {pipeline_mode = #tpu.pipeline_mode<synchronous>, transform_indices = @transform_3, window_bounds = array<i64: 4, 32, 8>}, {pipeline_mode = #tpu.pipeline_mode<synchronous>, transform_indices = @transform_4, window_bounds = array<i64: 4, 1, 8>}, {pipeline_mode = #tpu.pipeline_mode<synchronous>, transform_indices = @transform_5, window_bounds = array<i64: 4, 32, 8>}, {pipeline_mode = #tpu.pipeline_mode<synchronous>, transform_indices = @transform_6, window_bounds = array<i64: 4, 1, 8>}, {pipeline_mode = #tpu.pipeline_mode<synchronous>, transform_indices = @transform_7, window_bounds = array<i64: 4, 32, 8>}, {pipeline_mode = #tpu.pipeline_mode<synchronous>, transform_indices = @transform_8, window_bounds = array<i64: 4, 1, 8>}, {pipeline_mode = #tpu.pipeline_mode<synchronous>, transform_indices = @transform_9, window_bounds = array<i64: 4, 8, 32>}, {pipeline_mode = #tpu.pipeline_mode<synchronous>, transform_indices = @transform_10, window_bounds = array<i64: 1, 32>}, {pipeline_mode = #tpu.pipeline_mode<synchronous>, transform_indices = @transform_11, window_bounds = array<i64: 1, 32>}, {pipeline_mode = #tpu.pipeline_mode<synchronous>, transform_indices = @transform_12, window_bounds = array<i64: 1, 32>}, {pipeline_mode = #tpu.pipeline_mode<synchronous>, transform_indices = @transform_13, window_bounds = array<i64: 32, 64>}, {pipeline_mode = #tpu.pipeline_mode<synchronous>, transform_indices = @transform_14, window_bounds = array<i64: 1, 64>}, {pipeline_mode = #tpu.pipeline_mode<synchronous>, transform_indices = @transform_15, window_bounds = array<i64: 64, 32>}, {pipeline_mode = #tpu.pipeline_mode<synchronous>, transform_indices = @transform_16, window_bounds = array<i64: 1, 32>}, {pipeline_mode = #tpu.pipeline_mode<synchronous>, transform_indices = @transform_17, window_bounds = array<i64: 1, 32>}, {pipeline_mode = #tpu.pipeline_mode<synchronous>, transform_indices = @transform_18, window_bounds = array<i64: 1, 32>}, {transform_indices = @transform_19, window_bounds = array<i64: 1, 8, 32>}]} {
    %c0 = arith.constant 0 : index
    %c0_0 = arith.constant 0 : index
    %c0_1 = arith.constant 0 : index
    %0 = vector.load %arg2[%c0, %c0_0, %c0_1] : memref<1x8x32xf32, #tpu.memory_space<vmem>>, vector<1x8x32xf32>
    %1 = vector.shape_cast %0 : vector<1x8x32xf32> to vector<8x32xf32>
    %c0_2 = arith.constant 0 : index
    %c0_3 = arith.constant 0 : index
    %c0_4 = arith.constant 0 : index
    %2 = vector.load %arg3[%c0_2, %c0_3, %c0_4] : memref<1x8x32xf32, #tpu.memory_space<vmem>>, vector<1x8x32xf32>
    %3 = vector.shape_cast %2 : vector<1x8x32xf32> to vector<8x32xf32>
    %c0_5 = arith.constant 0 : index
    %c0_6 = arith.constant 0 : index
    %c0_7 = arith.constant 0 : index
    %4 = vector.load %arg4[%c0_5, %c0_6, %c0_7] : memref<1x8x8xf32, #tpu.memory_space<vmem>>, vector<1x8x8xf32>
    %5 = vector.shape_cast %4 : vector<1x8x8xf32> to vector<8x8xf32>
    %6 = arith.truncf %1 : vector<8x32xf32> to vector<8x32xbf16>
    %7 = arith.truncf %3 : vector<8x32xf32> to vector<8x32xbf16>
    %cst = arith.constant 0.000000e+00 : f32
    %8 = vector.broadcast %cst : f32 to vector<8x32xf32>
    %c0_8 = arith.constant 0 : index
    %c0_9 = arith.constant 0 : index
    %c0_10 = arith.constant 0 : index
    %9 = vector.load %arg5[%c0_8, %c0_9, %c0_10] : memref<4x32x8xbf16, #tpu.memory_space<vmem>>, vector<1x32x8xbf16>
    %10 = vector.shape_cast %9 : vector<1x32x8xbf16> to vector<32x8xbf16>
    %cst_11 = arith.constant dense<0.000000e+00> : vector<8x8xf32>
    %11 = tpu.matmul %6, %10, %cst_11 {dimension_numbers = #tpu.dot_dimension_numbers<[1], [0], [0], [1], [0, 0, 1, 1], [], []>} : vector<8x32xbf16>, vector<32x8xbf16>, vector<8x8xf32> -> vector<8x8xf32>
    %c0_12 = arith.constant 0 : index
    %c0_13 = arith.constant 0 : index
    %c0_14 = arith.constant 0 : index
    %12 = vector.load %arg6[%c0_12, %c0_13, %c0_14] : memref<4x1x8xf32, #tpu.memory_space<vmem>>, vector<1x1x8xf32>
    %13 = vector.shape_cast %12 : vector<1x1x8xf32> to vector<1x8xf32>
    %14 = vector.broadcast %13 : vector<1x8xf32> to vector<8x8xf32>
    %15 = arith.addf %11, %14 : vector<8x8xf32>
    %cst_15 = arith.constant 0.353553385 : f32
    %16 = vector.broadcast %cst_15 : f32 to vector<8x8xf32>
    %17 = arith.mulf %15, %16 : vector<8x8xf32>
    %c0_16 = arith.constant 0 : index
    %c0_17 = arith.constant 0 : index
    %c0_18 = arith.constant 0 : index
    %18 = vector.load %arg7[%c0_16, %c0_17, %c0_18] : memref<4x32x8xbf16, #tpu.memory_space<vmem>>, vector<1x32x8xbf16>
    %19 = vector.shape_cast %18 : vector<1x32x8xbf16> to vector<32x8xbf16>
    %cst_19 = arith.constant dense<0.000000e+00> : vector<8x8xf32>
    %20 = tpu.matmul %7, %19, %cst_19 {dimension_numbers = #tpu.dot_dimension_numbers<[1], [0], [0], [1], [0, 0, 1, 1], [], []>} : vector<8x32xbf16>, vector<32x8xbf16>, vector<8x8xf32> -> vector<8x8xf32>
    %c0_20 = arith.constant 0 : index
    %c0_21 = arith.constant 0 : index
    %c0_22 = arith.constant 0 : index
    %21 = vector.load %arg8[%c0_20, %c0_21, %c0_22] : memref<4x1x8xf32, #tpu.memory_space<vmem>>, vector<1x1x8xf32>
    %22 = vector.shape_cast %21 : vector<1x1x8xf32> to vector<1x8xf32>
    %23 = vector.broadcast %22 : vector<1x8xf32> to vector<8x8xf32>
    %24 = arith.addf %20, %23 : vector<8x8xf32>
    %c0_23 = arith.constant 0 : index
    %c0_24 = arith.constant 0 : index
    %c0_25 = arith.constant 0 : index
    %25 = vector.load %arg9[%c0_23, %c0_24, %c0_25] : memref<4x32x8xbf16, #tpu.memory_space<vmem>>, vector<1x32x8xbf16>
    %26 = vector.shape_cast %25 : vector<1x32x8xbf16> to vector<32x8xbf16>
    %cst_26 = arith.constant dense<0.000000e+00> : vector<8x8xf32>
    %27 = tpu.matmul %7, %26, %cst_26 {dimension_numbers = #tpu.dot_dimension_numbers<[1], [0], [0], [1], [0, 0, 1, 1], [], []>} : vector<8x32xbf16>, vector<32x8xbf16>, vector<8x8xf32> -> vector<8x8xf32>
    %c0_27 = arith.constant 0 : index
    %c0_28 = arith.constant 0 : index
    %c0_29 = arith.constant 0 : index
    %28 = vector.load %arg10[%c0_27, %c0_28, %c0_29] : memref<4x1x8xf32, #tpu.memory_space<vmem>>, vector<1x1x8xf32>
    %29 = vector.shape_cast %28 : vector<1x1x8xf32> to vector<1x8xf32>
    %30 = vector.broadcast %29 : vector<1x8xf32> to vector<8x8xf32>
    %31 = arith.addf %27, %30 : vector<8x8xf32>
    %32 = arith.truncf %17 : vector<8x8xf32> to vector<8x8xbf16>
    %33 = arith.truncf %24 : vector<8x8xf32> to vector<8x8xbf16>
    %cst_30 = arith.constant dense<0.000000e+00> : vector<8x8xf32>
    %34 = tpu.matmul %32, %33, %cst_30 {dimension_numbers = #tpu.dot_dimension_numbers<[1], [1], [0], [0], [0, 0, 1, 0], [], []>} : vector<8x8xbf16>, vector<8x8xbf16>, vector<8x8xf32> -> vector<8x8xf32>
    %35 = arith.addf %34, %5 : vector<8x8xf32>
    %cst_31 = arith.constant dense<0xFF800000> : vector<8xf32>
    %36 = vector.multi_reduction <maximumf>, %35, %cst_31 [1] : vector<8x8xf32> to vector<8xf32>
    %37 = vector.shape_cast %36 : vector<8xf32> to vector<8x1xf32>
    %38 = vector.broadcast %37 : vector<8x1xf32> to vector<8x8xf32>
    %39 = arith.subf %35, %38 : vector<8x8xf32>
    %40 = math.exp %39 : vector<8x8xf32>
    %cst_32 = arith.constant dense<0.000000e+00> : vector<8xf32>
    %41 = vector.multi_reduction <add>, %40, %cst_32 [1] : vector<8x8xf32> to vector<8xf32>
    %42 = vector.shape_cast %41 : vector<8xf32> to vector<8x1xf32>
    %43 = tpu.reciprocal %42 {approx = true} : vector<8x1xf32> -> vector<8x1xf32>
    %44 = vector.broadcast %43 : vector<8x1xf32> to vector<8x8xf32>
    %45 = arith.mulf %40, %44 : vector<8x8xf32>
    %46 = arith.truncf %45 : vector<8x8xf32> to vector<8x8xbf16>
    %47 = arith.truncf %31 : vector<8x8xf32> to vector<8x8xbf16>
    %cst_33 = arith.constant dense<0.000000e+00> : vector<8x8xf32>
    %48 = tpu.matmul %46, %47, %cst_33 {dimension_numbers = #tpu.dot_dimension_numbers<[1], [0], [0], [1], [0, 0, 1, 1], [], []>} : vector<8x8xbf16>, vector<8x8xbf16>, vector<8x8xf32> -> vector<8x8xf32>
    %49 = arith.truncf %48 : vector<8x8xf32> to vector<8x8xbf16>
    %c0_34 = arith.constant 0 : index
    %c0_35 = arith.constant 0 : index
    %c0_36 = arith.constant 0 : index
    %50 = vector.load %arg11[%c0_34, %c0_35, %c0_36] : memref<4x8x32xbf16, #tpu.memory_space<vmem>>, vector<1x8x32xbf16>
    %51 = vector.shape_cast %50 : vector<1x8x32xbf16> to vector<8x32xbf16>
    %cst_37 = arith.constant dense<0.000000e+00> : vector<8x32xf32>
    %52 = tpu.matmul %49, %51, %cst_37 {dimension_numbers = #tpu.dot_dimension_numbers<[1], [0], [0], [1], [0, 0, 1, 1], [], []>} : vector<8x8xbf16>, vector<8x32xbf16>, vector<8x32xf32> -> vector<8x32xf32>
    %53 = arith.addf %8, %52 : vector<8x32xf32>
    %c1 = arith.constant 1 : index
    %c0_38 = arith.constant 0 : index
    %c0_39 = arith.constant 0 : index
    %54 = vector.load %arg5[%c1, %c0_38, %c0_39] : memref<4x32x8xbf16, #tpu.memory_space<vmem>>, vector<1x32x8xbf16>
    %55 = vector.shape_cast %54 : vector<1x32x8xbf16> to vector<32x8xbf16>
    %cst_40 = arith.constant dense<0.000000e+00> : vector<8x8xf32>
    %56 = tpu.matmul %6, %55, %cst_40 {dimension_numbers = #tpu.dot_dimension_numbers<[1], [0], [0], [1], [0, 0, 1, 1], [], []>} : vector<8x32xbf16>, vector<32x8xbf16>, vector<8x8xf32> -> vector<8x8xf32>
    %c1_41 = arith.constant 1 : index
    %c0_42 = arith.constant 0 : index
    %c0_43 = arith.constant 0 : index
    %57 = vector.load %arg6[%c1_41, %c0_42, %c0_43] : memref<4x1x8xf32, #tpu.memory_space<vmem>>, vector<1x1x8xf32>
    %58 = vector.shape_cast %57 : vector<1x1x8xf32> to vector<1x8xf32>
    %59 = vector.broadcast %58 : vector<1x8xf32> to vector<8x8xf32>
    %60 = arith.addf %56, %59 : vector<8x8xf32>
    %cst_44 = arith.constant 0.353553385 : f32
    %61 = vector.broadcast %cst_44 : f32 to vector<8x8xf32>
    %62 = arith.mulf %60, %61 : vector<8x8xf32>
    %c1_45 = arith.constant 1 : index
    %c0_46 = arith.constant 0 : index
    %c0_47 = arith.constant 0 : index
    %63 = vector.load %arg7[%c1_45, %c0_46, %c0_47] : memref<4x32x8xbf16, #tpu.memory_space<vmem>>, vector<1x32x8xbf16>
    %64 = vector.shape_cast %63 : vector<1x32x8xbf16> to vector<32x8xbf16>
    %cst_48 = arith.constant dense<0.000000e+00> : vector<8x8xf32>
    %65 = tpu.matmul %7, %64, %cst_48 {dimension_numbers = #tpu.dot_dimension_numbers<[1], [0], [0], [1], [0, 0, 1, 1], [], []>} : vector<8x32xbf16>, vector<32x8xbf16>, vector<8x8xf32> -> vector<8x8xf32>
    %c1_49 = arith.constant 1 : index
    %c0_50 = arith.constant 0 : index
    %c0_51 = arith.constant 0 : index
    %66 = vector.load %arg8[%c1_49, %c0_50, %c0_51] : memref<4x1x8xf32, #tpu.memory_space<vmem>>, vector<1x1x8xf32>
    %67 = vector.shape_cast %66 : vector<1x1x8xf32> to vector<1x8xf32>
    %68 = vector.broadcast %67 : vector<1x8xf32> to vector<8x8xf32>
    %69 = arith.addf %65, %68 : vector<8x8xf32>
    %c1_52 = arith.constant 1 : index
    %c0_53 = arith.constant 0 : index
    %c0_54 = arith.constant 0 : index
    %70 = vector.load %arg9[%c1_52, %c0_53, %c0_54] : memref<4x32x8xbf16, #tpu.memory_space<vmem>>, vector<1x32x8xbf16>
    %71 = vector.shape_cast %70 : vector<1x32x8xbf16> to vector<32x8xbf16>
    %cst_55 = arith.constant dense<0.000000e+00> : vector<8x8xf32>
    %72 = tpu.matmul %7, %71, %cst_55 {dimension_numbers = #tpu.dot_dimension_numbers<[1], [0], [0], [1], [0, 0, 1, 1], [], []>} : vector<8x32xbf16>, vector<32x8xbf16>, vector<8x8xf32> -> vector<8x8xf32>
    %c1_56 = arith.constant 1 : index
    %c0_57 = arith.constant 0 : index
    %c0_58 = arith.constant 0 : index
    %73 = vector.load %arg10[%c1_56, %c0_57, %c0_58] : memref<4x1x8xf32, #tpu.memory_space<vmem>>, vector<1x1x8xf32>
    %74 = vector.shape_cast %73 : vector<1x1x8xf32> to vector<1x8xf32>
    %75 = vector.broadcast %74 : vector<1x8xf32> to vector<8x8xf32>
    %76 = arith.addf %72, %75 : vector<8x8xf32>
    %77 = arith.truncf %62 : vector<8x8xf32> to vector<8x8xbf16>
    %78 = arith.truncf %69 : vector<8x8xf32> to vector<8x8xbf16>
    %cst_59 = arith.constant dense<0.000000e+00> : vector<8x8xf32>
    %79 = tpu.matmul %77, %78, %cst_59 {dimension_numbers = #tpu.dot_dimension_numbers<[1], [1], [0], [0], [0, 0, 1, 0], [], []>} : vector<8x8xbf16>, vector<8x8xbf16>, vector<8x8xf32> -> vector<8x8xf32>
    %80 = arith.addf %79, %5 : vector<8x8xf32>
    %cst_60 = arith.constant dense<0xFF800000> : vector<8xf32>
    %81 = vector.multi_reduction <maximumf>, %80, %cst_60 [1] : vector<8x8xf32> to vector<8xf32>
    %82 = vector.shape_cast %81 : vector<8xf32> to vector<8x1xf32>
    %83 = vector.broadcast %82 : vector<8x1xf32> to vector<8x8xf32>
    %84 = arith.subf %80, %83 : vector<8x8xf32>
    %85 = math.exp %84 : vector<8x8xf32>
    %cst_61 = arith.constant dense<0.000000e+00> : vector<8xf32>
    %86 = vector.multi_reduction <add>, %85, %cst_61 [1] : vector<8x8xf32> to vector<8xf32>
    %87 = vector.shape_cast %86 : vector<8xf32> to vector<8x1xf32>
    %88 = tpu.reciprocal %87 {approx = true} : vector<8x1xf32> -> vector<8x1xf32>
    %89 = vector.broadcast %88 : vector<8x1xf32> to vector<8x8xf32>
    %90 = arith.mulf %85, %89 : vector<8x8xf32>
    %91 = arith.truncf %90 : vector<8x8xf32> to vector<8x8xbf16>
    %92 = arith.truncf %76 : vector<8x8xf32> to vector<8x8xbf16>
    %cst_62 = arith.constant dense<0.000000e+00> : vector<8x8xf32>
    %93 = tpu.matmul %91, %92, %cst_62 {dimension_numbers = #tpu.dot_dimension_numbers<[1], [0], [0], [1], [0, 0, 1, 1], [], []>} : vector<8x8xbf16>, vector<8x8xbf16>, vector<8x8xf32> -> vector<8x8xf32>
    %94 = arith.truncf %93 : vector<8x8xf32> to vector<8x8xbf16>
    %c1_63 = arith.constant 1 : index
    %c0_64 = arith.constant 0 : index
    %c0_65 = arith.constant 0 : index
    %95 = vector.load %arg11[%c1_63, %c0_64, %c0_65] : memref<4x8x32xbf16, #tpu.memory_space<vmem>>, vector<1x8x32xbf16>
    %96 = vector.shape_cast %95 : vector<1x8x32xbf16> to vector<8x32xbf16>
    %cst_66 = arith.constant dense<0.000000e+00> : vector<8x32xf32>
    %97 = tpu.matmul %94, %96, %cst_66 {dimension_numbers = #tpu.dot_dimension_numbers<[1], [0], [0], [1], [0, 0, 1, 1], [], []>} : vector<8x8xbf16>, vector<8x32xbf16>, vector<8x32xf32> -> vector<8x32xf32>
    %98 = arith.addf %53, %97 : vector<8x32xf32>
    %c2 = arith.constant 2 : index
    %c0_67 = arith.constant 0 : index
    %c0_68 = arith.constant 0 : index
    %99 = vector.load %arg5[%c2, %c0_67, %c0_68] : memref<4x32x8xbf16, #tpu.memory_space<vmem>>, vector<1x32x8xbf16>
    %100 = vector.shape_cast %99 : vector<1x32x8xbf16> to vector<32x8xbf16>
    %cst_69 = arith.constant dense<0.000000e+00> : vector<8x8xf32>
    %101 = tpu.matmul %6, %100, %cst_69 {dimension_numbers = #tpu.dot_dimension_numbers<[1], [0], [0], [1], [0, 0, 1, 1], [], []>} : vector<8x32xbf16>, vector<32x8xbf16>, vector<8x8xf32> -> vector<8x8xf32>
    %c2_70 = arith.constant 2 : index
    %c0_71 = arith.constant 0 : index
    %c0_72 = arith.constant 0 : index
    %102 = vector.load %arg6[%c2_70, %c0_71, %c0_72] : memref<4x1x8xf32, #tpu.memory_space<vmem>>, vector<1x1x8xf32>
    %103 = vector.shape_cast %102 : vector<1x1x8xf32> to vector<1x8xf32>
    %104 = vector.broadcast %103 : vector<1x8xf32> to vector<8x8xf32>
    %105 = arith.addf %101, %104 : vector<8x8xf32>
    %cst_73 = arith.constant 0.353553385 : f32
    %106 = vector.broadcast %cst_73 : f32 to vector<8x8xf32>
    %107 = arith.mulf %105, %106 : vector<8x8xf32>
    %c2_74 = arith.constant 2 : index
    %c0_75 = arith.constant 0 : index
    %c0_76 = arith.constant 0 : index
    %108 = vector.load %arg7[%c2_74, %c0_75, %c0_76] : memref<4x32x8xbf16, #tpu.memory_space<vmem>>, vector<1x32x8xbf16>
    %109 = vector.shape_cast %108 : vector<1x32x8xbf16> to vector<32x8xbf16>
    %cst_77 = arith.constant dense<0.000000e+00> : vector<8x8xf32>
    %110 = tpu.matmul %7, %109, %cst_77 {dimension_numbers = #tpu.dot_dimension_numbers<[1], [0], [0], [1], [0, 0, 1, 1], [], []>} : vector<8x32xbf16>, vector<32x8xbf16>, vector<8x8xf32> -> vector<8x8xf32>
    %c2_78 = arith.constant 2 : index
    %c0_79 = arith.constant 0 : index
    %c0_80 = arith.constant 0 : index
    %111 = vector.load %arg8[%c2_78, %c0_79, %c0_80] : memref<4x1x8xf32, #tpu.memory_space<vmem>>, vector<1x1x8xf32>
    %112 = vector.shape_cast %111 : vector<1x1x8xf32> to vector<1x8xf32>
    %113 = vector.broadcast %112 : vector<1x8xf32> to vector<8x8xf32>
    %114 = arith.addf %110, %113 : vector<8x8xf32>
    %c2_81 = arith.constant 2 : index
    %c0_82 = arith.constant 0 : index
    %c0_83 = arith.constant 0 : index
    %115 = vector.load %arg9[%c2_81, %c0_82, %c0_83] : memref<4x32x8xbf16, #tpu.memory_space<vmem>>, vector<1x32x8xbf16>
    %116 = vector.shape_cast %115 : vector<1x32x8xbf16> to vector<32x8xbf16>
    %cst_84 = arith.constant dense<0.000000e+00> : vector<8x8xf32>
    %117 = tpu.matmul %7, %116, %cst_84 {dimension_numbers = #tpu.dot_dimension_numbers<[1], [0], [0], [1], [0, 0, 1, 1], [], []>} : vector<8x32xbf16>, vector<32x8xbf16>, vector<8x8xf32> -> vector<8x8xf32>
    %c2_85 = arith.constant 2 : index
    %c0_86 = arith.constant 0 : index
    %c0_87 = arith.constant 0 : index
    %118 = vector.load %arg10[%c2_85, %c0_86, %c0_87] : memref<4x1x8xf32, #tpu.memory_space<vmem>>, vector<1x1x8xf32>
    %119 = vector.shape_cast %118 : vector<1x1x8xf32> to vector<1x8xf32>
    %120 = vector.broadcast %119 : vector<1x8xf32> to vector<8x8xf32>
    %121 = arith.addf %117, %120 : vector<8x8xf32>
    %122 = arith.truncf %107 : vector<8x8xf32> to vector<8x8xbf16>
    %123 = arith.truncf %114 : vector<8x8xf32> to vector<8x8xbf16>
    %cst_88 = arith.constant dense<0.000000e+00> : vector<8x8xf32>
    %124 = tpu.matmul %122, %123, %cst_88 {dimension_numbers = #tpu.dot_dimension_numbers<[1], [1], [0], [0], [0, 0, 1, 0], [], []>} : vector<8x8xbf16>, vector<8x8xbf16>, vector<8x8xf32> -> vector<8x8xf32>
    %125 = arith.addf %124, %5 : vector<8x8xf32>
    %cst_89 = arith.constant dense<0xFF800000> : vector<8xf32>
    %126 = vector.multi_reduction <maximumf>, %125, %cst_89 [1] : vector<8x8xf32> to vector<8xf32>
    %127 = vector.shape_cast %126 : vector<8xf32> to vector<8x1xf32>
    %128 = vector.broadcast %127 : vector<8x1xf32> to vector<8x8xf32>
    %129 = arith.subf %125, %128 : vector<8x8xf32>
    %130 = math.exp %129 : vector<8x8xf32>
    %cst_90 = arith.constant dense<0.000000e+00> : vector<8xf32>
    %131 = vector.multi_reduction <add>, %130, %cst_90 [1] : vector<8x8xf32> to vector<8xf32>
    %132 = vector.shape_cast %131 : vector<8xf32> to vector<8x1xf32>
    %133 = tpu.reciprocal %132 {approx = true} : vector<8x1xf32> -> vector<8x1xf32>
    %134 = vector.broadcast %133 : vector<8x1xf32> to vector<8x8xf32>
    %135 = arith.mulf %130, %134 : vector<8x8xf32>
    %136 = arith.truncf %135 : vector<8x8xf32> to vector<8x8xbf16>
    %137 = arith.truncf %121 : vector<8x8xf32> to vector<8x8xbf16>
    %cst_91 = arith.constant dense<0.000000e+00> : vector<8x8xf32>
    %138 = tpu.matmul %136, %137, %cst_91 {dimension_numbers = #tpu.dot_dimension_numbers<[1], [0], [0], [1], [0, 0, 1, 1], [], []>} : vector<8x8xbf16>, vector<8x8xbf16>, vector<8x8xf32> -> vector<8x8xf32>
    %139 = arith.truncf %138 : vector<8x8xf32> to vector<8x8xbf16>
    %c2_92 = arith.constant 2 : index
    %c0_93 = arith.constant 0 : index
    %c0_94 = arith.constant 0 : index
    %140 = vector.load %arg11[%c2_92, %c0_93, %c0_94] : memref<4x8x32xbf16, #tpu.memory_space<vmem>>, vector<1x8x32xbf16>
    %141 = vector.shape_cast %140 : vector<1x8x32xbf16> to vector<8x32xbf16>
    %cst_95 = arith.constant dense<0.000000e+00> : vector<8x32xf32>
    %142 = tpu.matmul %139, %141, %cst_95 {dimension_numbers = #tpu.dot_dimension_numbers<[1], [0], [0], [1], [0, 0, 1, 1], [], []>} : vector<8x8xbf16>, vector<8x32xbf16>, vector<8x32xf32> -> vector<8x32xf32>
    %143 = arith.addf %98, %142 : vector<8x32xf32>
    %c3 = arith.constant 3 : index
    %c0_96 = arith.constant 0 : index
    %c0_97 = arith.constant 0 : index
    %144 = vector.load %arg5[%c3, %c0_96, %c0_97] : memref<4x32x8xbf16, #tpu.memory_space<vmem>>, vector<1x32x8xbf16>
    %145 = vector.shape_cast %144 : vector<1x32x8xbf16> to vector<32x8xbf16>
    %cst_98 = arith.constant dense<0.000000e+00> : vector<8x8xf32>
    %146 = tpu.matmul %6, %145, %cst_98 {dimension_numbers = #tpu.dot_dimension_numbers<[1], [0], [0], [1], [0, 0, 1, 1], [], []>} : vector<8x32xbf16>, vector<32x8xbf16>, vector<8x8xf32> -> vector<8x8xf32>
    %c3_99 = arith.constant 3 : index
    %c0_100 = arith.constant 0 : index
    %c0_101 = arith.constant 0 : index
    %147 = vector.load %arg6[%c3_99, %c0_100, %c0_101] : memref<4x1x8xf32, #tpu.memory_space<vmem>>, vector<1x1x8xf32>
    %148 = vector.shape_cast %147 : vector<1x1x8xf32> to vector<1x8xf32>
    %149 = vector.broadcast %148 : vector<1x8xf32> to vector<8x8xf32>
    %150 = arith.addf %146, %149 : vector<8x8xf32>
    %cst_102 = arith.constant 0.353553385 : f32
    %151 = vector.broadcast %cst_102 : f32 to vector<8x8xf32>
    %152 = arith.mulf %150, %151 : vector<8x8xf32>
    %c3_103 = arith.constant 3 : index
    %c0_104 = arith.constant 0 : index
    %c0_105 = arith.constant 0 : index
    %153 = vector.load %arg7[%c3_103, %c0_104, %c0_105] : memref<4x32x8xbf16, #tpu.memory_space<vmem>>, vector<1x32x8xbf16>
    %154 = vector.shape_cast %153 : vector<1x32x8xbf16> to vector<32x8xbf16>
    %cst_106 = arith.constant dense<0.000000e+00> : vector<8x8xf32>
    %155 = tpu.matmul %7, %154, %cst_106 {dimension_numbers = #tpu.dot_dimension_numbers<[1], [0], [0], [1], [0, 0, 1, 1], [], []>} : vector<8x32xbf16>, vector<32x8xbf16>, vector<8x8xf32> -> vector<8x8xf32>
    %c3_107 = arith.constant 3 : index
    %c0_108 = arith.constant 0 : index
    %c0_109 = arith.constant 0 : index
    %156 = vector.load %arg8[%c3_107, %c0_108, %c0_109] : memref<4x1x8xf32, #tpu.memory_space<vmem>>, vector<1x1x8xf32>
    %157 = vector.shape_cast %156 : vector<1x1x8xf32> to vector<1x8xf32>
    %158 = vector.broadcast %157 : vector<1x8xf32> to vector<8x8xf32>
    %159 = arith.addf %155, %158 : vector<8x8xf32>
    %c3_110 = arith.constant 3 : index
    %c0_111 = arith.constant 0 : index
    %c0_112 = arith.constant 0 : index
    %160 = vector.load %arg9[%c3_110, %c0_111, %c0_112] : memref<4x32x8xbf16, #tpu.memory_space<vmem>>, vector<1x32x8xbf16>
    %161 = vector.shape_cast %160 : vector<1x32x8xbf16> to vector<32x8xbf16>
    %cst_113 = arith.constant dense<0.000000e+00> : vector<8x8xf32>
    %162 = tpu.matmul %7, %161, %cst_113 {dimension_numbers = #tpu.dot_dimension_numbers<[1], [0], [0], [1], [0, 0, 1, 1], [], []>} : vector<8x32xbf16>, vector<32x8xbf16>, vector<8x8xf32> -> vector<8x8xf32>
    %c3_114 = arith.constant 3 : index
    %c0_115 = arith.constant 0 : index
    %c0_116 = arith.constant 0 : index
    %163 = vector.load %arg10[%c3_114, %c0_115, %c0_116] : memref<4x1x8xf32, #tpu.memory_space<vmem>>, vector<1x1x8xf32>
    %164 = vector.shape_cast %163 : vector<1x1x8xf32> to vector<1x8xf32>
    %165 = vector.broadcast %164 : vector<1x8xf32> to vector<8x8xf32>
    %166 = arith.addf %162, %165 : vector<8x8xf32>
    %167 = arith.truncf %152 : vector<8x8xf32> to vector<8x8xbf16>
    %168 = arith.truncf %159 : vector<8x8xf32> to vector<8x8xbf16>
    %cst_117 = arith.constant dense<0.000000e+00> : vector<8x8xf32>
    %169 = tpu.matmul %167, %168, %cst_117 {dimension_numbers = #tpu.dot_dimension_numbers<[1], [1], [0], [0], [0, 0, 1, 0], [], []>} : vector<8x8xbf16>, vector<8x8xbf16>, vector<8x8xf32> -> vector<8x8xf32>
    %170 = arith.addf %169, %5 : vector<8x8xf32>
    %cst_118 = arith.constant dense<0xFF800000> : vector<8xf32>
    %171 = vector.multi_reduction <maximumf>, %170, %cst_118 [1] : vector<8x8xf32> to vector<8xf32>
    %172 = vector.shape_cast %171 : vector<8xf32> to vector<8x1xf32>
    %173 = vector.broadcast %172 : vector<8x1xf32> to vector<8x8xf32>
    %174 = arith.subf %170, %173 : vector<8x8xf32>
    %175 = math.exp %174 : vector<8x8xf32>
    %cst_119 = arith.constant dense<0.000000e+00> : vector<8xf32>
    %176 = vector.multi_reduction <add>, %175, %cst_119 [1] : vector<8x8xf32> to vector<8xf32>
    %177 = vector.shape_cast %176 : vector<8xf32> to vector<8x1xf32>
    %178 = tpu.reciprocal %177 {approx = true} : vector<8x1xf32> -> vector<8x1xf32>
    %179 = vector.broadcast %178 : vector<8x1xf32> to vector<8x8xf32>
    %180 = arith.mulf %175, %179 : vector<8x8xf32>
    %181 = arith.truncf %180 : vector<8x8xf32> to vector<8x8xbf16>
    %182 = arith.truncf %166 : vector<8x8xf32> to vector<8x8xbf16>
    %cst_120 = arith.constant dense<0.000000e+00> : vector<8x8xf32>
    %183 = tpu.matmul %181, %182, %cst_120 {dimension_numbers = #tpu.dot_dimension_numbers<[1], [0], [0], [1], [0, 0, 1, 1], [], []>} : vector<8x8xbf16>, vector<8x8xbf16>, vector<8x8xf32> -> vector<8x8xf32>
    %184 = arith.truncf %183 : vector<8x8xf32> to vector<8x8xbf16>
    %c3_121 = arith.constant 3 : index
    %c0_122 = arith.constant 0 : index
    %c0_123 = arith.constant 0 : index
    %185 = vector.load %arg11[%c3_121, %c0_122, %c0_123] : memref<4x8x32xbf16, #tpu.memory_space<vmem>>, vector<1x8x32xbf16>
    %186 = vector.shape_cast %185 : vector<1x8x32xbf16> to vector<8x32xbf16>
    %cst_124 = arith.constant dense<0.000000e+00> : vector<8x32xf32>
    %187 = tpu.matmul %184, %186, %cst_124 {dimension_numbers = #tpu.dot_dimension_numbers<[1], [0], [0], [1], [0, 0, 1, 1], [], []>} : vector<8x8xbf16>, vector<8x32xbf16>, vector<8x32xf32> -> vector<8x32xf32>
    %188 = arith.addf %143, %187 : vector<8x32xf32>
    %c0_125 = arith.constant 0 : index
    %c0_126 = arith.constant 0 : index
    %189 = vector.load %arg12[%c0_125, %c0_126] : memref<1x32xf32, #tpu.memory_space<vmem>>, vector<1x32xf32>
    %190 = vector.shape_cast %189 : vector<1x32xf32> to vector<32xf32>
    %191 = vector.shape_cast %190 : vector<32xf32> to vector<1x32xf32>
    %192 = vector.broadcast %191 : vector<1x32xf32> to vector<8x32xf32>
    %193 = arith.addf %188, %192 : vector<8x32xf32>
    %194 = arith.addf %1, %193 : vector<8x32xf32>
    %c0_127 = arith.constant 0 : index
    %c0_128 = arith.constant 0 : index
    %195 = vector.load %arg13[%c0_127, %c0_128] : memref<1x32xf32, #tpu.memory_space<vmem>>, vector<1x32xf32>
    %196 = vector.shape_cast %195 : vector<1x32xf32> to vector<32xf32>
    %c0_129 = arith.constant 0 : index
    %c0_130 = arith.constant 0 : index
    %197 = vector.load %arg14[%c0_129, %c0_130] : memref<1x32xf32, #tpu.memory_space<vmem>>, vector<1x32xf32>
    %198 = vector.shape_cast %197 : vector<1x32xf32> to vector<32xf32>
    %cst_131 = arith.constant dense<0.000000e+00> : vector<8xf32>
    %199 = vector.multi_reduction <add>, %194, %cst_131 [1] : vector<8x32xf32> to vector<8xf32>
    %200 = vector.shape_cast %199 : vector<8xf32> to vector<8x1xf32>
    %cst_132 = arith.constant 3.200000e+01 : f32
    %201 = vector.broadcast %cst_132 : f32 to vector<8x1xf32>
    %202 = arith.divf %200, %201 : vector<8x1xf32>
    %203 = vector.broadcast %202 : vector<8x1xf32> to vector<8x32xf32>
    %204 = arith.subf %194, %203 : vector<8x32xf32>
    %205 = arith.mulf %204, %204 : vector<8x32xf32>
    %cst_133 = arith.constant dense<0.000000e+00> : vector<8xf32>
    %206 = vector.multi_reduction <add>, %205, %cst_133 [1] : vector<8x32xf32> to vector<8xf32>
    %207 = vector.shape_cast %206 : vector<8xf32> to vector<8x1xf32>
    %cst_134 = arith.constant 3.200000e+01 : f32
    %208 = vector.broadcast %cst_134 : f32 to vector<8x1xf32>
    %209 = arith.divf %207, %208 : vector<8x1xf32>
    %210 = vector.broadcast %202 : vector<8x1xf32> to vector<8x32xf32>
    %211 = arith.subf %194, %210 : vector<8x32xf32>
    %cst_135 = arith.constant 9.99999996E-13 : f32
    %212 = vector.broadcast %cst_135 : f32 to vector<8x1xf32>
    %213 = arith.addf %209, %212 : vector<8x1xf32>
    %214 = math.rsqrt %213 : vector<8x1xf32>
    %215 = vector.broadcast %214 : vector<8x1xf32> to vector<8x32xf32>
    %216 = arith.mulf %211, %215 : vector<8x32xf32>
    %217 = vector.shape_cast %196 : vector<32xf32> to vector<1x32xf32>
    %218 = vector.broadcast %217 : vector<1x32xf32> to vector<8x32xf32>
    %219 = arith.mulf %216, %218 : vector<8x32xf32>
    %220 = vector.shape_cast %198 : vector<32xf32> to vector<1x32xf32>
    %221 = vector.broadcast %220 : vector<1x32xf32> to vector<8x32xf32>
    %222 = arith.addf %219, %221 : vector<8x32xf32>
    %223 = arith.truncf %222 : vector<8x32xf32> to vector<8x32xbf16>
    %c0_136 = arith.constant 0 : index
    %c0_137 = arith.constant 0 : index
    %224 = vector.load %arg15[%c0_136, %c0_137] : memref<32x64xbf16, #tpu.memory_space<vmem>>, vector<32x64xbf16>
    %cst_138 = arith.constant dense<0.000000e+00> : vector<8x64xf32>
    %225 = tpu.matmul %223, %224, %cst_138 {dimension_numbers = #tpu.dot_dimension_numbers<[1], [0], [0], [1], [0, 0, 1, 1], [], []>} : vector<8x32xbf16>, vector<32x64xbf16>, vector<8x64xf32> -> vector<8x64xf32>
    %c0_139 = arith.constant 0 : index
    %c0_140 = arith.constant 0 : index
    %226 = vector.load %arg16[%c0_139, %c0_140] : memref<1x64xf32, #tpu.memory_space<vmem>>, vector<1x64xf32>
    %227 = vector.shape_cast %226 : vector<1x64xf32> to vector<64xf32>
    %228 = vector.shape_cast %227 : vector<64xf32> to vector<1x64xf32>
    %229 = vector.broadcast %228 : vector<1x64xf32> to vector<8x64xf32>
    %230 = arith.addf %225, %229 : vector<8x64xf32>
    %cst_141 = arith.constant 0.000000e+00 : f32
    %231 = vector.broadcast %cst_141 : f32 to vector<8x64xf32>
    %232 = arith.maximumf %230, %231 : vector<8x64xf32>
    %233 = arith.truncf %232 : vector<8x64xf32> to vector<8x64xbf16>
    %c0_142 = arith.constant 0 : index
    %c0_143 = arith.constant 0 : index
    %234 = vector.load %arg17[%c0_142, %c0_143] : memref<64x32xbf16, #tpu.memory_space<vmem>>, vector<64x32xbf16>
    %cst_144 = arith.constant dense<0.000000e+00> : vector<8x32xf32>
    %235 = tpu.matmul %233, %234, %cst_144 {dimension_numbers = #tpu.dot_dimension_numbers<[1], [0], [0], [1], [0, 0, 1, 1], [], []>} : vector<8x64xbf16>, vector<64x32xbf16>, vector<8x32xf32> -> vector<8x32xf32>
    %c0_145 = arith.constant 0 : index
    %c0_146 = arith.constant 0 : index
    %236 = vector.load %arg18[%c0_145, %c0_146] : memref<1x32xf32, #tpu.memory_space<vmem>>, vector<1x32xf32>
    %237 = vector.shape_cast %236 : vector<1x32xf32> to vector<32xf32>
    %238 = vector.shape_cast %237 : vector<32xf32> to vector<1x32xf32>
    %239 = vector.broadcast %238 : vector<1x32xf32> to vector<8x32xf32>
    %240 = arith.addf %235, %239 : vector<8x32xf32>
    %241 = arith.addf %222, %240 : vector<8x32xf32>
    %c0_147 = arith.constant 0 : index
    %c0_148 = arith.constant 0 : index
    %242 = vector.load %arg19[%c0_147, %c0_148] : memref<1x32xf32, #tpu.memory_space<vmem>>, vector<1x32xf32>
    %243 = vector.shape_cast %242 : vector<1x32xf32> to vector<32xf32>
    %c0_149 = arith.constant 0 : index
    %c0_150 = arith.constant 0 : index
    %244 = vector.load %arg20[%c0_149, %c0_150] : memref<1x32xf32, #tpu.memory_space<vmem>>, vector<1x32xf32>
    %245 = vector.shape_cast %244 : vector<1x32xf32> to vector<32xf32>
    %cst_151 = arith.constant dense<0.000000e+00> : vector<8xf32>
    %246 = vector.multi_reduction <add>, %241, %cst_151 [1] : vector<8x32xf32> to vector<8xf32>
    %247 = vector.shape_cast %246 : vector<8xf32> to vector<8x1xf32>
    %cst_152 = arith.constant 3.200000e+01 : f32
    %248 = vector.broadcast %cst_152 : f32 to vector<8x1xf32>
    %249 = arith.divf %247, %248 : vector<8x1xf32>
    %250 = vector.broadcast %249 : vector<8x1xf32> to vector<8x32xf32>
    %251 = arith.subf %241, %250 : vector<8x32xf32>
    %252 = arith.mulf %251, %251 : vector<8x32xf32>
    %cst_153 = arith.constant dense<0.000000e+00> : vector<8xf32>
    %253 = vector.multi_reduction <add>, %252, %cst_153 [1] : vector<8x32xf32> to vector<8xf32>
    %254 = vector.shape_cast %253 : vector<8xf32> to vector<8x1xf32>
    %cst_154 = arith.constant 3.200000e+01 : f32
    %255 = vector.broadcast %cst_154 : f32 to vector<8x1xf32>
    %256 = arith.divf %254, %255 : vector<8x1xf32>
    %257 = vector.broadcast %249 : vector<8x1xf32> to vector<8x32xf32>
    %258 = arith.subf %241, %257 : vector<8x32xf32>
    %cst_155 = arith.constant 9.99999996E-13 : f32
    %259 = vector.broadcast %cst_155 : f32 to vector<8x1xf32>
    %260 = arith.addf %256, %259 : vector<8x1xf32>
    %261 = math.rsqrt %260 : vector<8x1xf32>
    %262 = vector.broadcast %261 : vector<8x1xf32> to vector<8x32xf32>
    %263 = arith.mulf %258, %262 : vector<8x32xf32>
    %264 = vector.shape_cast %243 : vector<32xf32> to vector<1x32xf32>
    %265 = vector.broadcast %264 : vector<1x32xf32> to vector<8x32xf32>
    %266 = arith.mulf %263, %265 : vector<8x32xf32>
    %267 = vector.shape_cast %245 : vector<32xf32> to vector<1x32xf32>
    %268 = vector.broadcast %267 : vector<1x32xf32> to vector<8x32xf32>
    %269 = arith.addf %266, %268 : vector<8x32xf32>
    %c0_156 = arith.constant 0 : index
    %c0_157 = arith.constant 0 : index
    %c0_158 = arith.constant 0 : index
    %270 = vector.load %arg21[%c0_156, %c0_157, %c0_158] : memref<1x8x32xf32, #tpu.memory_space<vmem>>, vector<1x8x32xf32>
    %271 = vector.shape_cast %270 : vector<1x8x32xf32> to vector<8x32xf32>
    %272 = vector.shape_cast %269 : vector<8x32xf32> to vector<1x8x32xf32>
    tpu.vector_store %arg21[%c0_156, %c0_157, %c0_158], %272 {strides = array<i32>} : memref<1x8x32xf32, #tpu.memory_space<vmem>>, vector<1x8x32xf32>,
    return
  }
  func.func @transform_0(%arg0: i32, %arg1: i32) -> (i32, i32, i32) {
    %c0_i32 = arith.constant 0 : i32
    %c0_i32_0 = arith.constant 0 : i32
    return %arg0, %arg1, %c0_i32 : i32, i32, i32
  }
  func.func @transform_1(%arg0: i32, %arg1: i32) -> (i32, i32, i32) {
    %c0_i32 = arith.constant 0 : i32
    %c0_i32_0 = arith.constant 0 : i32
    %c0_i32_1 = arith.constant 0 : i32
    return %arg0, %c0_i32, %c0_i32_0 : i32, i32, i32
  }
  func.func @transform_2(%arg0: i32, %arg1: i32) -> (i32, i32, i32) {
    %c0_i32 = arith.constant 0 : i32
    %c0_i32_0 = arith.constant 0 : i32
    return %arg0, %arg1, %c0_i32 : i32, i32, i32
  }
  func.func @transform_3(%arg0: i32, %arg1: i32) -> (i32, i32, i32) {
    %c0_i32 = arith.constant 0 : i32
    %c0_i32_0 = arith.constant 0 : i32
    %c0_i32_1 = arith.constant 0 : i32
    %c0_i32_2 = arith.constant 0 : i32
    return %c0_i32, %c0_i32_0, %c0_i32_1 : i32, i32, i32
  }
  func.func @transform_4(%arg0: i32, %arg1: i32) -> (i32, i32, i32) {
    %c0_i32 = arith.constant 0 : i32
    %c0_i32_0 = arith.constant 0 : i32
    %c0_i32_1 = arith.constant 0 : i32
    %c0_i32_2 = arith.constant 0 : i32
    return %c0_i32, %c0_i32_0, %c0_i32_1 : i32, i32, i32
  }
  func.func @transform_5(%arg0: i32, %arg1: i32) -> (i32, i32, i32) {
    %c0_i32 = arith.constant 0 : i32
    %c0_i32_0 = arith.constant 0 : i32
    %c0_i32_1 = arith.constant 0 : i32
    %c0_i32_2 = arith.constant 0 : i32
    return %c0_i32, %c0_i32_0, %c0_i32_1 : i32, i32, i32
  }
  func.func @transform_6(%arg0: i32, %arg1: i32) -> (i32, i32, i32) {
    %c0_i32 = arith.constant 0 : i32
    %c0_i32_0 = arith.constant 0 : i32
    %c0_i32_1 = arith.constant 0 : i32
    %c0_i32_2 = arith.constant 0 : i32
    return %c0_i32, %c0_i32_0, %c0_i32_1 : i32, i32, i32
  }
  func.func @transform_7(%arg0: i32, %arg1: i32) -> (i32, i32, i32) {
    %c0_i32 = arith.constant 0 : i32
    %c0_i32_0 = arith.constant 0 : i32
    %c0_i32_1 = arith.constant 0 : i32
    %c0_i32_2 = arith.constant 0 : i32
    return %c0_i32, %c0_i32_0, %c0_i32_1 : i32, i32, i32
  }
  func.func @transform_8(%arg0: i32, %arg1: i32) -> (i32, i32, i32) {
    %c0_i32 = arith.constant 0 : i32
    %c0_i32_0 = arith.constant 0 : i32
    %c0_i32_1 = arith.constant 0 : i32
    %c0_i32_2 = arith.constant 0 : i32
    return %c0_i32, %c0_i32_0, %c0_i32_1 : i32, i32, i32
  }
  func.func @transform_9(%arg0: i32, %arg1: i32) -> (i32, i32, i32) {
    %c0_i32 = arith.constant 0 : i32
    %c0_i32_0 = arith.constant 0 : i32
    %c0_i32_1 = arith.constant 0 : i32
    %c0_i32_2 = arith.constant 0 : i32
    return %c0_i32, %c0_i32_0, %c0_i32_1 : i32, i32, i32
  }
  func.func @transform_10(%arg0: i32, %arg1: i32) -> (i32, i32) {
    %c0_i32 = arith.constant 0 : i32
    %c0_i32_0 = arith.constant 0 : i32
    %c0_i32_1 = arith.constant 0 : i32
    return %c0_i32, %c0_i32_0 : i32, i32
  }
  func.func @transform_11(%arg0: i32, %arg1: i32) -> (i32, i32) {
    %c0_i32 = arith.constant 0 : i32
    %c0_i32_0 = arith.constant 0 : i32
    %c0_i32_1 = arith.constant 0 : i32
    return %c0_i32, %c0_i32_0 : i32, i32
  }
  func.func @transform_12(%arg0: i32, %arg1: i32) -> (i32, i32) {
    %c0_i32 = arith.constant 0 : i32
    %c0_i32_0 = arith.constant 0 : i32
    %c0_i32_1 = arith.constant 0 : i32
    return %c0_i32, %c0_i32_0 : i32, i32
  }
  func.func @transform_13(%arg0: i32, %arg1: i32) -> (i32, i32) {
    %c0_i32 = arith.constant 0 : i32
    %c0_i32_0 = arith.constant 0 : i32
    %c0_i32_1 = arith.constant 0 : i32
    return %c0_i32, %c0_i32_0 : i32, i32
  }
  func.func @transform_14(%arg0: i32, %arg1: i32) -> (i32, i32) {
    %c0_i32 = arith.constant 0 : i32
    %c0_i32_0 = arith.constant 0 : i32
    %c0_i32_1 = arith.constant 0 : i32
    return %c0_i32, %c0_i32_0 : i32, i32
  }
  func.func @transform_15(%arg0: i32, %arg1: i32) -> (i32, i32) {
    %c0_i32 = arith.constant 0 : i32
    %c0_i32_0 = arith.constant 0 : i32
    %c0_i32_1 = arith.constant 0 : i32
    return %c0_i32, %c0_i32_0 : i32, i32
  }
  func.func @transform_16(%arg0: i32, %arg1: i32) -> (i32, i32) {
    %c0_i32 = arith.constant 0 : i32
    %c0_i32_0 = arith.constant 0 : i32
    %c0_i32_1 = arith.constant 0 : i32
    return %c0_i32, %c0_i32_0 : i32, i32
  }
  func.func @transform_17(%arg0: i32, %arg1: i32) -> (i32, i32) {
    %c0_i32 = arith.constant 0 : i32
    %c0_i32_0 = arith.constant 0 : i32
    %c0_i32_1 = arith.constant 0 : i32
    return %c0_i32, %c0_i32_0 : i32, i32
  }
  func.func @transform_18(%arg0: i32, %arg1: i32) -> (i32, i32) {
    %c0_i32 = arith.constant 0 : i32
    %c0_i32_0 = arith.constant 0 : i32
    %c0_i32_1 = arith.constant 0 : i32
    return %c0_i32, %c0_i32_0 : i32, i32
  }
  func.func @transform_19(%arg0: i32, %arg1: i32) -> (i32, i32, i32) {
    %c0_i32 = arith.constant 0 : i32
    %c0_i32_0 = arith.constant 0 : i32
    return %arg0, %arg1, %c0_i32 : i32, i32, i32
  }
}

</mosaic_0001>

<bundles_post_ra>
// kernel: tpu_custom_call.1
= control target key start
LH: loop header
LB: loop body
LE: loop exit
PB: predicated region body
PF: predicated region fallthrough
CT: control target
= control target key end

     0   :  { %s2553_s0 = inlined_call_operand.vmem [shape: f32[2,8,32], index: 0, kind: input, shape index: {}]   ;;  %s2554_s1 = inlined_call_operand.vmem [shape: f32[2,8,32], index: 1, kind: input, shape index: {}]   ;;  %s2555_s2 = inlined_call_operand.vmem [shape: f32[2,8,8], index: 2, kind: input, shape index: {}]   ;;  %s2556_s3 = inlined_call_operand.vmem [shape: bf16[4,32,8], index: 3, kind: input, shape index: {}]   ;;  %s2557_s4 = inlined_call_operand.vmem [shape: f32[4,1,8], index: 4, kind: input, shape index: {}]   ;;  %s2558_s5 = inlined_call_operand.vmem [shape: bf16[4,32,8], index: 5, kind: input, shape index: {}]   ;;  %s2559_s6 = inlined_call_operand.vmem [shape: f32[4,1,8], index: 6, kind: input, shape index: {}]   ;;  %s2560_s7 = inlined_call_operand.vmem [shape: bf16[4,32,8], index: 7, kind: input, shape index: {}]   ;;  %s2561_s8 = inlined_call_operand.vmem [shape: f32[4,1,8], index: 8, kind: input, shape index: {}]   ;;  %s2562_s9 = inlined_call_operand.vmem [shape: bf16[4,8,32], index: 9, kind: input, shape index: {}]   ;;  %s2563_s10 = inlined_call_operand.vmem [shape: f32[1,32], index: 10, kind: input, shape index: {}]   ;;  %s2564_s11 = inlined_call_operand.vmem [shape: f32[1,32], index: 11, kind: input, shape index: {}]   ;;  %s2565_s12 = inlined_call_operand.vmem [shape: f32[1,32], index: 12, kind: input, shape index: {}]   ;;  %s2566_s13 = inlined_call_operand.vmem [shape: bf16[32,64], index: 13, kind: input, shape index: {}]   ;;  %s2567_s14 = inlined_call_operand.vmem [shape: f32[1,64], index: 14, kind: input, shape index: {}]   ;;  %s2568_s15 = inlined_call_operand.vmem [shape: bf16[64,32], index: 15, kind: input, shape index: {}]   ;;  %s2569_s16 = inlined_call_operand.vmem [shape: f32[1,32], index: 16, kind: input, shape index: {}]   ;;  %s2570_s17 = inlined_call_operand.vmem [shape: f32[1,32], index: 17, kind: input, shape index: {}]   ;;  %s2571_s18 = inlined_call_operand.vmem [shape: f32[1,32], index: 18, kind: input, shape index: {}]   ;;  %s2572_s19 = inlined_call_operand.hbm [shape: f32[2,8,32], index: 19, kind: output, shape index: {}]  }
   0x1   :  { %2583 = sst [smem:[#allocation13_spill]] %s2553_s0 }
   0x2   :  { %2584 = sst [smem:[#allocation14_spill]] %s2554_s1 }
   0x3   :  { %2585 = sst [smem:[#allocation15_spill]] %s2555_s2 }
   0x4   :  { %2586 = sst [smem:[#allocation16_spill]] %s2556_s3 }
   0x5   :  { %2587 = sst [smem:[#allocation17_spill]] %s2557_s4 }
   0x6   :  { %2588 = sst [smem:[#allocation18_spill]] %s2571_s18 }
   0x7   :  { %24 = vsyncpa [#allocation3], 0 }
   0x8   :  { %26 = vsyncpa [#allocation3 + $0x1], 0  ;;  %s2203_s0 = smov 0   ;;  %s2205_s30 = smov 0  }
   0x9   :  { %s2207_s20 = smov 0   ;;  %s2209_s21 = smov 0  }
   0xa   :  { %s2211_s1 = smov 0   ;;  %s2213_s22 = smov 0  }
   0xb LB: > { %2589 = sst [smem:[#allocation5_spill]] %s2080_s0  ;;  %s1688_s2 = sadd.s32 4294967295, %s2100_s22   ;;  %s2100_s22 = sphi %s2213_s22, %s32_s22   ;;  %s2096_s1 = sphi %s2211_s1, %s2613_s1   ;;  %s2092_s21 = sphi %s2209_s21, %s2612_s21   ;;  %s2088_s20 = sphi %s2207_s20, %s2611_s20   ;;  %s2084_s30 = sphi %s2205_s30, %s2615_s30   ;;  %s2080_s0 = sphi %s2203_s0, %s2614_s0  }
   0xc   : > { %2590 = sst [smem:[#allocation6_spill]] %s2088_s20  ;;  %s1689_s23 = sadd.s32 4294967294, %s2100_s22  }
   0xd   : > { %2591 = sst [smem:[#allocation7_spill]] %s2096_s1  ;;  %s44_s24 = sadd.s32 1, %s2096_s1 }
   0xe   : > { %2592 = sst [smem:[#allocation8_spill]] %s2100_s22  ;;  %s471_s25 = sadd.s32 1, %s2088_s20 }
   0xf   : > { %p46_p0 = scmp.ge.s32.totalorder %s44_s24, 2  ;;  %p481_p1 = scmp.ne.s32.totalorder %s2088_s20, %s2084_s30 }
  0x10   : > { %p482_p2 = scmp.eq.s32.totalorder %s1688_s2, 1  ;;  %p487_p3 = scmp.ne.s32.totalorder %s2084_s30, %s2080_s0 }
  0x11   : > { %s2617_s24 = smov (%p46_p0, %s44_s24), 0  ;;  %p488_p5 = scmp.eq.s32.totalorder %s1689_s23, 1 }
  0x12   : > { %2593 = sst [smem:[#allocation9_spill]] %s2617_s24  ;;  %p2243_p4 = por %p482_p2, %p481_p1 }
  0x13   : > { %s466_s26 = ssub.s32 %s2096_s1, %s2617_s24  ;;  %p1692_p6 = scmp.ge.s32.totalorder %s2100_s22, 1 }
  0x14   : > { %s2594_s3 = scalar_select %p2243_p4, 1, 0 }
  0x15   : > { %p469_p7 = scmp.eq.s32.totalorder %s466_s26, 0  ;;  %p2250_p8 = por %p488_p5, %p487_p3 }
  0x16   : > { %2595 = sst [smem:[#allocation10_spill]] %s2594_s3  ;;  %p581_p9 = scmp.lt.s32.totalorder %s2100_s22, 3 }
  0x17   : > { %s2596_s27 = scalar_select %p2250_p8, 1, 0 }
  0x18   : > { %s2256_s28 = scalar_select %p469_p7, %s2088_s20, %s471_s25  }
  0x19   : > { %2597 = sst [smem:[#allocation11_spill]] %s2596_s27  ;;  %p582_p10 = pnand %p1692_p6, %p581_p9 }
  0x1a   : > { %2598 = sst [smem:[#allocation12_spill]] %s2256_s28  ;;  %p650_p11 = scmp.lt.s32.totalorder (!%p582_p10), %s2092_s21, 1 }
  0x1b   : > { %585 = sbr.rel (%p582_p10) target bundleno = 3115 (0xc2b), region = 96  ;;  %s2599_s0 = sld [smem:[#allocation16_spill]] (!%p582_p10) }
  0x1c   : > { %s2601_s20 = sld [smem:[#allocation13_spill]] (!%p582_p10) }
  0x1d   : > { %s2602_s22 = sld [smem:[#allocation14_spill]] (!%p582_p10) }
  0x1e   : > { %s2603_s4 = sld [smem:[#allocation17_spill]] (!%p582_p10) }
  0x20   : > { %v1898_v1 = vld [vmem:[%s2558_s5 + $0x8] sm:$0xff]  ;;  %v1897_v3 = vld [vmem:[%s2558_s5] sm:$0xff]  ;;  %s651_s28 = scalar_select %p650_p11, %s2092_s21, 1  ;;  %vm694_vm0 = vcmask 261120   ;;  %vm783_vm1 = vcmask 64512   ;;  %v1904_v22 = vld [vmem:[%s2558_s5 + $0x18] sm:$0xff] }
  0x21   : > { %s2600_s18 = smov %s2599_s0  ;;  %v1896_v0 = vld [vmem:[%s2599_s0 + $0x8] sm:$0xff]  ;;  %741 = vmatpush.bf16.msra.mxu1 %v1898_v1  ;;  %v1982_v9 = vld [vmem:[%s2559_s6] ss:$0 sm:$0xff]  ;;  %v1903_v28 = vld [vmem:[%s2558_s5 + $0x10] sm:$0xff]  ;;  %vm819_vm2 = vcmask 1043456   ;;  %vm1522_vm7 = vcmask 523264  }
  0x22   : > { %v1895_v2 = vld [vmem:[%s2600_s18] sm:$0xff]  ;;  %704 = vmatpush.bf16.msra.mxu0 %v1896_v0  ;;  %s2272_s29 = sshll.u32 %s651_s28, 3  ;;  %v1900_v20 = vld [vmem:[%s2560_s7 + $0x8] sm:$0xff]  ;;  %v1902_v29 = vld [vmem:[%s2600_s18 + $0x18] sm:$0xff]  ;;  %s647_s0 = sand.u32 1, %s2084_s30  }
  0x23   : > { %s656_s3 = scalar_lea.vmem %s2601_s20, %s2272_s29  ;;  %s660_s24 = scalar_lea.vmem %s2602_s22, %s2272_s29  ;;  %774 = vmatpush.bf16.msra.mxu2 %v1900_v20  ;;  %v1899_v21 = vld [vmem:[%s2560_s7] sm:$0xff]  ;;  %v1901_v30 = vld [vmem:[%s2600_s18 + $0x10] sm:$0xff]  ;;  %v1906_v50 = vld [vmem:[%s2560_s7 + $0x18] sm:$0xff] }
  0x24   : > { %v2282_v4 = vld [vmem:[%s656_s3] sm:$0xff]  ;;  %s2604_s20 = sld [smem:[#allocation15_spill]]  ;;  %v1905_v51 = vld [vmem:[%s2560_s7 + $0x10] sm:$0xff]  ;;  %s1693_s2 = sshll.u32 %s647_s0, 3 }
  0x25   : > { %742 = vmatpush.bf16.msra.mxu1 %v1897_v3  ;;  %v670_v5 = vld [vmem:[%s660_s24] sm:$0xff]  ;;  %v2286_v6 = vpack.c.bf16 %v2282_v4, %v2282_v4  ;;  %s1892_s3 = sshll.u32 %s2092_s21, 3  ;;  %s649_s25 = scalar_lea.vmem [#allocation2], %s1693_s2 }
  0x26   : > { %705 = vmatpush.bf16.msra.mxu0 %v1895_v2  ;;  %v2288_v7 = vpack.c.bf16 %v670_v5, %v670_v5  ;;  %v1981_v8 = vld [vmem:[%s2603_s4] ss:$0 sm:$0xff]  ;;  %v1984_v43 = vld [vmem:[%s2559_s6 + $0x1] ss:$0 sm:$0xff]  ;;  %s1585_s22 = scalar_lea.hbm %s2572_s19, %s1892_s3  ;;  %s1587_s21 = sshll.u32 %s649_s25, 4  ;;  %s1588_s21 = int_to_ptr.vmem [resolvable:$true] %s1587_s21 }
  0x27   : > { %775 = vmatpush.bf16.msra.mxu2 %v1899_v21  ;;  %v1983_v38 = vld [vmem:[%s2561_s8] ss:$0 sm:$0xff]  ;;  %v1985_v56 = vld [vmem:[%s2603_s4 + $0x1] ss:$0 sm:$0xff]  ;;  %v1910_v21 = vld [vmem:[%s2558_s5 + $0x28] sm:$0xff]  ;;  %s1574_s23 = scalar_lea.sflag [#allocation3], %s647_s0 }
  0x28   : > { %1714 = vmatmul.msk.bf16.vlgmr.msra.gmra.mxu1 %vm694_vm0, %v2288_v7  ;;  %v837_v60 = vld [vmem:[%s2562_s9] sm:$0xf]  ;;  %s2042_s2 = scalar_lea.hbm %s2572_s19, 16 }
  0x29   : > { %1705 = vmatmul.msk.bf16.vlgmr.msra.gmra.mxu0 %vm694_vm0, %v2286_v6  ;;  %866 = vmatpush.bf16.msrb.mxu1 %v1902_v29  ;;  %v1023_v61 = vsel %vm819_vm2, %v837_v60, 0  ;;  %v1986_v62 = vld [vmem:[%s2561_s8 + $0x1] ss:$0 sm:$0xff] }
  0x2a   : > { %1723 = vmatmul.msk.bf16.vlgmr.msra.gmra.mxu2 %vm694_vm0, %v2288_v7  ;;  %s667_s1 = scalar_lea.vmem %s2604_s20, %s2272_s29  ;;  %s2606_s29 = sld [smem:[#allocation18_spill]] }
  0x2b   : > { %902 = vmatpush.bf16.msrb.mxu2 %v1904_v22  ;;  %v2317_v23 = vld [vmem:[%s667_s1] sm:$0xff]  ;;  %v1908_v22 = vld [vmem:[%s2600_s18 + $0x28] sm:$0xff] }
  0x2d   : > { %867 = vmatpush.bf16.msrb.mxu1 %v1901_v30  ;;  %v1770_v30 = vld [vmem:[%s2562_s9 + $0x4] sm:$0xf] }
  0x2f   : > { %903 = vmatpush.bf16.msrb.mxu2 %v1903_v28 }
  0x38   : > { %1739 = vmatmul.msk.bf16.vlgmr.msrb.gmra.mxu1 %vm694_vm0, %v2286_v6 }
  0x3a   : > { %1753 = vmatmul.msk.bf16.vlgmr.msrb.gmra.mxu2 %vm694_vm0, %v2288_v7 }
  0xa5   : > { %v744_v11 = vpop.f32.mrf.mxu1 }
  0xa6   : > { %v707_v10 = vpop.f32.mrf.mxu0  ;;  %v745_v13 = vadd.f32 %v1982_v9, %v744_v11 }
  0xa7   : > { %v708_v12 = vadd.f32 %v1981_v8, %v707_v10 }
  0xa8   : > { %v782_v14 = vpack.c.bf16 %v745_v13, %v745_v13 }
  0xa9   : > { %v711_v15 = vmul.f32 0.35355338, %v708_v12 }
  0xaa   : > { %v788_v16 = vsel %vm783_vm1, %v782_v14, 0 }
  0xab   : > { %797 = vmatpush.bf16.xpose.msra.mxu3 %v788_v16  ;;  %v781_v19 = vpack.c.bf16 %v711_v15, %v711_v15 }
  0xad   : > { %v746_v18 = vpop.f32.mrf.mxu1  ;;  %v777_v31 = vpop.f32.mrf.mxu2 }
  0xae   : > { %v709_v17 = vpop.f32.mrf.mxu0  ;;  %v778_v39 = vadd.f32 %v1983_v38, %v777_v31  ;;  %v1004_v31 = vsel %vm819_vm2, %v1770_v30, 0  ;;  %v1988_v38 = vld [vmem:[%s2603_s4 + $0x2] ss:$0 sm:$0xff] }
  0xaf   : > { %1013 = vmatpush.bf16.msra.mxu2 %v1004_v31  ;;  %v1918_v31 = vld [vmem:[%s2560_s7 + $0x38] sm:$0xff] }
  0xb0   : > { %v815_v40 = vpack.c.bf16 %v778_v39, %v778_v39 }
  0xb2   : > { %1724 = vmatmul.msk.bf16.vlgmr.msra.gmra.mxu3 %vm783_vm1, %v781_v19  ;;  %v821_v41 = vsel %vm819_vm2, %v815_v40, 0 }
  0xb3   : > { %830 = vmatpush.bf16.msrb.mxu0 %v821_v41  ;;  %937 = vmatpush.bf16.msrb.mxu3 %v1906_v50 }
  0xb5   : > { %v779_v35 = vpop.f32.mrf.mxu2  ;;  %v869_v46 = vpop.f32.mrf.mxu1 }
  0xb6   : > { %v870_v57 = vadd.f32 %v1985_v56, %v869_v46  ;;  %v1989_v56 = vld [vmem:[%s2561_s8 + $0x2] ss:$0 sm:$0xff] }
  0xb7   : > { %938 = vmatpush.bf16.msrb.mxu3 %v1905_v51 }
  0xb8   : > { %v873_v58 = vmul.f32 0.35355338, %v870_v57 }
  0xba   : > { %v944_v59 = vpack.c.bf16 %v873_v58, %v873_v58 }
  0xbb   : > { %1032 = vmatpush.bf16.msra.mxu3 %v1023_v61 }
  0xbd   : > { %v905_v42 = vpop.f32.mrf.mxu2  ;;  %v871_v49 = vpop.f32.mrf.mxu1 }
  0xbe   : > { %v906_v44 = vadd.f32 %v1984_v43, %v905_v42  ;;  %v1911_v49 = vld [vmem:[%s2560_s7 + $0x20] sm:$0xff] }
  0xc0   : > { %v945_v45 = vpack.c.bf16 %v906_v44, %v906_v44 }
  0xc2   : > { %v950_v47 = vsel %vm783_vm1, %v945_v45, 0  ;;  %1767 = vmatmul.msk.bf16.vlgmr.msrb.gmra.mxu3 %vm694_vm0, %v2288_v7 }
  0xc3   : > { %959 = vmatpush.bf16.xpose.msra.mxu0 %v950_v47 }
  0xc5   : > { %v907_v48 = vpop.f32.mrf.mxu2 }
  0xc6   : > { %v1912_v48 = vld [vmem:[%s2560_s7 + $0x28] sm:$0xff] }
  0xc7   : > { %1137 = vmatpush.bf16.msrb.mxu2 %v1912_v48 }
  0xcb   : > { %1138 = vmatpush.bf16.msrb.mxu2 %v1911_v49  ;;  %v1863_v49 = vld [vmem:[%s2562_s9 + $0xc] sm:$0xf] }
 0x135   : > { %v799_v24 = vpop.f32.mrf.mxu3 }
 0x136   : > { %v800_v25 = vadd.f32 %v799_v24, %v2317_v23  ;;  %v1909_v24 = vld [vmem:[%s2558_s5 + $0x20] sm:$0xff] }
 0x138   : > { %v803_v26 = vsel %vm783_vm1, %v800_v25, -inf }
 0x139   : > { %804 = vmax.xlane.f32.xlu0 %v803_v26 }
 0x13d   : > { %v801_v27 = vpop.f32.mrf.mxu3 }
 0x145   : > { %v940_v63 = vpop.f32.mrf.mxu3 }
 0x146   : > { %v941_v1 = vadd.f32 %v1986_v62, %v940_v63 }
 0x148   : > { %v977_v3 = vpack.c.bf16 %v941_v1, %v941_v1 }
 0x14a   : > { %v982_v5 = vsel %vm819_vm2, %v977_v3, 0  ;;  %v1915_v3 = vld [vmem:[%s2558_s5 + $0x30] sm:$0xff] }
 0x14b   : > { %991 = vmatpush.bf16.msra.mxu1 %v982_v5  ;;  %v1914_v5 = vld [vmem:[%s2600_s18 + $0x38] sm:$0xff] }
 0x14d   : > { %v942_v8 = vpop.f32.mrf.mxu3 }
 0x14e   : > { %v1913_v8 = vld [vmem:[%s2600_s18 + $0x30] sm:$0xff] }
 0x14f   : > { %1102 = vmatpush.bf16.msrb.mxu1 %v1910_v21 }
 0x153   : > { %1103 = vmatpush.bf16.msrb.mxu1 %v1909_v24 }
 0x1ac   : > { %v805_v32 = vpop.xlane.xlu0 %804 }
 0x1ad   : > { %v806_v33 = vsub.f32 %v800_v25, %v805_v32  ;;  %v1907_v25 = vld [vmem:[%s2600_s18 + $0x20] sm:$0xff] }
 0x1af   : > { %v807_v34 = vmul.f32 1.442695, %v806_v33 }
 0x1b1   : > { %2000 = vpow2.f32 %v807_v34 }
 0x1b7   : > { %v2001_v36 = vpop.eup %2000 }
 0x1b8   : > { %v809_v37 = vsel %vm783_vm1, %v2001_v36, 0.0 }
 0x1b9   : > { %810 = vadd.xlane.f32.xlu0 %v809_v37  ;;  %v1987_v37 = vld [vmem:[%s2559_s6 + $0x2] ss:$0 sm:$0xff] }
 0x22c   : > { %v811_v52 = vpop.xlane.xlu0 %810 }
 0x22d   : > { %2002 = vrcp.f32 %v811_v52 }
 0x233   : > { %v2003_v53 = vpop.eup %2002 }
 0x234   : > { %v813_v54 = vmul.f32 %v2003_v53, %v2001_v36 }
 0x236   : > { %v814_v55 = vpack.c.bf16 %v813_v54, %v813_v54 }
 0x238   : > { %1725 = vmatmul.msk.bf16.vlgmr.msrb.gmra.mxu0 %vm783_vm1, %v814_v55  ;;  %v1916_v55 = vld [vmem:[%s2558_s5 + $0x38] sm:$0xff] }
 0x239   : > { %1066 = vmatpush.bf16.msrb.mxu0 %v1908_v22 }
 0x23d   : > { %1067 = vmatpush.bf16.msrb.mxu0 %v1907_v25 }
 0x248   : > { %1768 = vmatmul.msk.bf16.vlgmr.msra.gmra.mxu0 %vm783_vm1, %v944_v59 }
 0x258   : > { %1786 = vmatmul.msk.bf16.vlgmr.msrb.gmra.mxu0 %vm694_vm0, %v2286_v6 }
 0x2b5   : > { %v832_v0 = vpop.f32.mrf.mxu0 }
 0x2b6   : > { %v836_v2 = vpack.c.bf16 %v832_v0, %v832_v0 }
 0x2b8   : > { %1772 = vmatmul.msk.bf16.vlgmr.msra.gmra.mxu3 %vm783_vm1, %v836_v2 }
 0x2bd   : > { %v834_v9 = vpop.f32.mrf.mxu0 }
 0x2be   : > { %v1817_v9 = vld [vmem:[%s2562_s9 + $0x8] sm:$0xf] }
 0x2c5   : > { %v961_v10 = vpop.f32.mrf.mxu0 }
 0x2c6   : > { %v962_v11 = vadd.f32 %v961_v10, %v2317_v23  ;;  %v1204_v10 = vsel %vm819_vm2, %v1817_v9, 0 }
 0x2c8   : > { %v965_v12 = vsel %vm783_vm1, %v962_v11, -inf }
 0x2c9   : > { %966 = vmax.xlane.f32.xlu1 %v965_v12 }
 0x2cd   : > { %v963_v13 = vpop.f32.mrf.mxu0 }
 0x2d5   : > { %v1069_v32 = vpop.f32.mrf.mxu0 }
 0x2d6   : > { %v1070_v41 = vadd.f32 %v1988_v38, %v1069_v32  ;;  %v1917_v32 = vld [vmem:[%s2560_s7 + $0x30] sm:$0xff] }
 0x2d8   : > { %v1073_v44 = vmul.f32 0.35355338, %v1070_v41  ;;  %v1992_v41 = vld [vmem:[%s2561_s8 + $0x3] ss:$0 sm:$0xff] }
 0x2da   : > { %v1144_v46 = vpack.c.bf16 %v1073_v44, %v1073_v44 }
 0x2dd   : > { %v1071_v33 = vpop.f32.mrf.mxu0 }
 0x33b   : > { %v2367_v14 = vpop.f32.mrf.mxu3 }
 0x33c   : > { %v967_v15 = vpop.xlane.xlu1 %966 }
 0x33d   : > { %v968_v16 = vsub.f32 %v962_v11, %v967_v15 }
 0x33f   : > { %v969_v17 = vmul.f32 1.442695, %v968_v16  ;;  %v1990_v16 = vld [vmem:[%s2559_s6 + $0x3] ss:$0 sm:$0xff] }
 0x341   : > { %2004 = vpow2.f32 %v969_v17 }
 0x343   : > { %v1036_v18 = vpop.f32.mrf.mxu3 }
 0x347   : > { %v2005_v19 = vpop.eup %2004 }
 0x348   : > { %v971_v20 = vsel %vm783_vm1, %v2005_v19, 0.0 }
 0x349   : > { %972 = vadd.xlane.f32.xlu1 %v971_v20 }
 0x3bc   : > { %v973_v26 = vpop.xlane.xlu1 %972 }
 0x3bd   : > { %2006 = vrcp.f32 %v973_v26  ;;  %v1991_v26 = vld [vmem:[%s2603_s4 + $0x3] ss:$0 sm:$0xff]  ;;  %s1589_s4 = sshll.u32 %s1585_s22, 4  ;;  %s1590_s4 = int_to_ptr.hbm [resolvable:$true] %s1589_s4 }
 0x3be   : > { %s2036_s24 = sshra.s32 %s1590_s4, 4  ;;  %s2037_s24 = int_to_ptr.hbm [resolvable:$true] %s2036_s24 }
 0x3bf   : > { %s2038_s3 = scalar_lea.hbm %s2037_s24, 8  ;;  %p2043_p1 = scmp.lt.s32.totalorder %s2037_s24, %s2572_s19 }
 0x3c0   : > { %p2039_p12 = scmp.ne.s32.totalorder %s2037_s24, %s2038_s3  ;;  %p2044_p2 = scmp.lt.s32.totalorder %s2042_s2, %s2038_s3 }
 0x3c2   : > { %p2040_p13 = pnand %p2039_p12, %p2243_p4  ;;  %p2045_p3 = por %p2044_p2, %p2043_p1 }
 0x3c3   : > { %v2007_v27 = vpop.eup %2006 }
 0x3c4   : > { %v975_v28 = vmul.f32 %v2007_v27, %v2005_v19  ;;  %p2041_p0 = pneg %p2040_p13 }
 0x3c6   : > { %v976_v29 = vpack.c.bf16 %v975_v28, %v975_v28  ;;  %p2046_p5 = pnand %p2045_p3, %p2041_p0 }
 0x3c8   : > { %1769 = vmatmul.msk.bf16.vlgmr.msra.gmra.mxu1 %vm783_vm1, %v976_v29 }
 0x3c9   : > { %1213 = vmatpush.bf16.msra.mxu1 %v1204_v10 }
 0x3d8   : > { %1800 = vmatmul.msk.bf16.vlgmr.msrb.gmra.mxu1 %vm694_vm0, %v2288_v7 }
 0x445   : > { %v993_v34 = vpop.f32.mrf.mxu1 }
 0x446   : > { %v997_v35 = vpack.c.bf16 %v993_v34, %v993_v34 }
 0x448   : > { %1771 = vmatmul.msk.bf16.vlgmr.msra.gmra.mxu2 %vm783_vm1, %v997_v35 }
 0x449   : > { %1248 = vmatpush.bf16.msra.mxu2 %v1914_v5 }
 0x44d   : > { %v995_v36 = vpop.f32.mrf.mxu1  ;;  %1249 = vmatpush.bf16.msra.mxu2 %v1913_v8 }
 0x455   : > { %v1105_v39 = vpop.f32.mrf.mxu1 }
 0x456   : > { %v1106_v40 = vadd.f32 %v1987_v37, %v1105_v39 }
 0x458   : > { %v1145_v42 = vpack.c.bf16 %v1106_v40, %v1106_v40  ;;  %1814 = vmatmul.msk.bf16.vlgmr.msrb.gmra.mxu2 %vm694_vm0, %v2288_v7 }
 0x45a   : > { %v1150_v43 = vsel %vm783_vm1, %v1145_v42, 0 }
 0x45b   : > { %1159 = vmatpush.bf16.xpose.msrb.mxu3 %v1150_v43 }
 0x45d   : > { %v1107_v45 = vpop.f32.mrf.mxu1 }
 0x462   : > { %1815 = vmatmul.msk.bf16.vlgmr.msrb.gmra.mxu3 %vm783_vm1, %v1144_v46 }
 0x463   : > { %1284 = vmatpush.bf16.msra.mxu3 %v1916_v55 }
 0x467   : > { %1285 = vmatpush.bf16.msra.mxu3 %v1915_v3 }
 0x468   : > { %1832 = vmatmul.msk.bf16.vlgmr.msra.gmra.mxu2 %vm694_vm0, %v2286_v6 }
 0x472   : > { %1846 = vmatmul.msk.bf16.vlgmr.msra.gmra.mxu3 %vm694_vm0, %v2288_v7 }
 0x4cb   : > { %v2400_v47 = vpop.f32.mrf.mxu2 }
 0x4cc   : > { %v1035_v33 = vadd.f32 %v2367_v14, %v2400_v47 }
 0x4d3   : > { %v1017_v50 = vpop.f32.mrf.mxu2 }
 0x4d4   : > { %v1386_v50 = vsel %vm819_vm2, %v1863_v49, 0 }
 0x4d5   : > { %1395 = vmatpush.bf16.msrb.mxu3 %v1386_v50 }
 0x4db   : > { %v1140_v57 = vpop.f32.mrf.mxu2 }
 0x4dc   : > { %v1141_v58 = vadd.f32 %v1989_v56, %v1140_v57 }
 0x4de   : > { %v1177_v60 = vpack.c.bf16 %v1141_v58, %v1141_v58  ;;  %v1993_v58 = vld [vmem:[%s2563_s10] ss:$0 sm:$0xff] }
 0x4e0   : > { %v1182_v62 = vsel %vm819_vm2, %v1177_v60, 0 }
 0x4e1   : > { %1191 = vmatpush.bf16.msra.mxu0 %v1182_v62 }
 0x4e3   : > { %v1142_v0 = vpop.f32.mrf.mxu2 }
 0x4e5   : > { %v1161_v51 = vpop.f32.mrf.mxu3  ;;  %1319 = vmatpush.bf16.msrb.mxu0 %v1918_v31  ;;  %v1995_v31 = vld [vmem:[%s2565_s12] ss:$0 sm:$0xff] }
 0x4e6   : > { %v1162_v52 = vadd.f32 %v1161_v51, %v2317_v23 }
 0x4e8   : > { %v1165_v53 = vsel %vm783_vm1, %v1162_v52, -inf }
 0x4e9   : > { %1166 = vmax.xlane.f32.xlu2 %v1165_v53  ;;  %1320 = vmatpush.bf16.msrb.mxu0 %v1917_v32 }
 0x4eb   : > { %v1251_v20 = vpop.f32.mrf.mxu2 }
 0x4ec   : > { %v1252_v27 = vadd.f32 %v1991_v26, %v1251_v20  ;;  %v1923_v20 = vld [vmem:[%s2568_s15 + $0x10] sm:$0xff] }
 0x4ed   : > { %v1163_v54 = vpop.f32.mrf.mxu3 }
 0x4ee   : > { %v1255_v29 = vmul.f32 0.35355338, %v1252_v27 }
 0x4f0   : > { %v1326_v30 = vpack.c.bf16 %v1255_v29, %v1255_v29  ;;  %v1994_v29 = vld [vmem:[%s2564_s11] ss:$0 sm:$0xff] }
 0x4f3   : > { %v1253_v22 = vpop.f32.mrf.mxu2 }
 0x4f5   : > { %v1287_v17 = vpop.f32.mrf.mxu3 }
 0x4f6   : > { %v1288_v6 = vadd.f32 %v1990_v16, %v1287_v17  ;;  %v1919_v17 = vld [vmem:[%s2566_s13] sm:$0xff] }
 0x4f8   : > { %v1327_v18 = vpack.c.bf16 %v1288_v6, %v1288_v6  ;;  %v1924_v6 = vld [vmem:[%s2568_s15 + $0x18] sm:$0xff] }
 0x4fa   : > { %v1332_v19 = vsel %vm783_vm1, %v1327_v18, 0 }
 0x4fb   : > { %1341 = vmatpush.bf16.xpose.msrb.mxu1 %v1332_v19 }
 0x4fd   : > { %v1289_v21 = vpop.f32.mrf.mxu3 }
 0x55c   : > { %v1167_v59 = vpop.xlane.xlu2 %1166 }
 0x55d   : > { %v1168_v61 = vsub.f32 %v1162_v52, %v1167_v59 }
 0x55f   : > { %v1169_v63 = vmul.f32 1.442695, %v1168_v61 }
 0x561   : > { %2008 = vpow2.f32 %v1169_v63 }
 0x567   : > { %v2009_v1 = vpop.eup %2008 }
 0x568   : > { %v1171_v2 = vsel %vm783_vm1, %v2009_v1, 0.0 }
 0x569   : > { %1172 = vadd.xlane.f32.xlu2 %v1171_v2 }
 0x5dc   : > { %v1173_v11 = vpop.xlane.xlu2 %1172 }
 0x5dd   : > { %2010 = vrcp.f32 %v1173_v11 }
 0x5e3   : > { %v2011_v12 = vpop.eup %2010 }
 0x5e4   : > { %v1175_v13 = vmul.f32 %v2011_v12, %v2009_v1  ;;  %v2102_v1 = vmov 32.0  }
 0x5e6   : > { %v1176_v15 = vpack.c.bf16 %v1175_v13, %v1175_v13 }
 0x5e8   : > { %1816 = vmatmul.msk.bf16.vlgmr.msra.gmra.mxu0 %vm783_vm1, %v1176_v15 }
 0x5f8   : > { %1860 = vmatmul.msk.bf16.vlgmr.msrb.gmra.mxu0 %vm694_vm0, %v2288_v7 }
 0x665   : > { %v1193_v24 = vpop.f32.mrf.mxu0 }
 0x666   : > { %v1197_v25 = vpack.c.bf16 %v1193_v24, %v1193_v24 }
 0x668   : > { %1818 = vmatmul.msk.bf16.vlgmr.msra.gmra.mxu1 %vm783_vm1, %v1197_v25 }
 0x669   : > { %1530 = vmatpush.bf16.msra.mxu1 %v1924_v6 }
 0x66d   : > { %v1195_v28 = vpop.f32.mrf.mxu0  ;;  %1531 = vmatpush.bf16.msra.mxu1 %v1923_v20 }
 0x675   : > { %v1322_v42 = vpop.f32.mrf.mxu0 }
 0x676   : > { %v1323_v43 = vadd.f32 %v1992_v41, %v1322_v42 }
 0x678   : > { %1861 = vmatmul.msk.bf16.vlgmr.msrb.gmra.mxu1 %vm783_vm1, %v1326_v30  ;;  %v1359_v14 = vpack.c.bf16 %v1323_v43, %v1323_v43 }
 0x67a   : > { %v1364_v44 = vsel %vm819_vm2, %v1359_v14, 0  ;;  %v1997_v14 = vld [vmem:[%s2569_s16] ss:$0 sm:$0xff] }
 0x67b   : > { %1373 = vmatpush.bf16.msrb.mxu2 %v1364_v44 }
 0x67d   : > { %v1324_v45 = vpop.f32.mrf.mxu0 }
 0x6e5   : > { %v1215_v34 = vpop.f32.mrf.mxu1 }
 0x6e6   : > { %v1219_v35 = vadd.f32 %v1215_v34, %v1035_v33 }
 0x6ed   : > { %v1217_v36 = vpop.f32.mrf.mxu1 }
 0x6ee   : > { %v1922_v36 = vld [vmem:[%s2568_s15 + $0x8] sm:$0xff] }
 0x6ef   : > { %1532 = vmatpush.bf16.msra.mxu1 %v1922_v36 }
 0x6f5   : > { %v1343_v37 = vpop.f32.mrf.mxu1 }
 0x6f6   : > { %v1344_v38 = vadd.f32 %v1343_v37, %v2317_v23  ;;  %v1921_v37 = vld [vmem:[%s2568_s15] sm:$0xff] }
 0x6f7   : > { %1533 = vmatpush.bf16.msra.mxu1 %v1921_v37 }
 0x6f8   : > { %v1347_v39 = vsel %vm783_vm1, %v1344_v38, -inf }
 0x6f9   : > { %1348 = vmax.xlane.f32.xlu0 %v1347_v39 }
 0x6fd   : > { %v1345_v40 = vpop.f32.mrf.mxu1 }
 0x76c   : > { %v1349_v7 = vpop.xlane.xlu0 %1348 }
 0x76d   : > { %v1350_v46 = vsub.f32 %v1344_v38, %v1349_v7  ;;  %v1996_v38 = vld [vmem:[%s2567_s14] ss:$0 sm:$0xff] }
 0x76f   : > { %v1351_v47 = vmul.f32 1.442695, %v1350_v46 }
 0x771   : > { %2012 = vpow2.f32 %v1351_v47 }
 0x777   : > { %v2013_v23 = vpop.eup %2012 }
 0x778   : > { %v1353_v48 = vsel %vm783_vm1, %v2013_v23, 0.0 }
 0x779   : > { %1354 = vadd.xlane.f32.xlu1 %v1353_v48 }
 0x7ec   : > { %v1355_v51 = vpop.xlane.xlu1 %1354 }
 0x7ed   : > { %2014 = vrcp.f32 %v1355_v51 }
 0x7ee   : > { %2016 = vrcp.f32 %v2102_v1 }
 0x7f3   : > { %v2015_v52 = vpop.eup %2014 }
 0x7f4   : > { %v1357_v53 = vmul.f32 %v2015_v52, %v2013_v23  ;;  %v2017_v2 = vpop.eup %2016 }
 0x7f5   : > { %v1414_v3 = vmul.f32 32.0, %v2017_v2  ;;  %vm1418_vm3 = vweird.f32 %v2017_v2 }
 0x7f6   : > { %v1358_v54 = vpack.c.bf16 %v1357_v53, %v1357_v53 }
 0x7f7   : > { %v1415_v5 = vsub.f32 1.0, %v1414_v3 }
 0x7f8   : > { %1862 = vmatmul.msk.bf16.vlgmr.msrb.gmra.mxu2 %vm783_vm1, %v1358_v54 }
 0x7f9   : > { %v1416_v8 = vmul.f32 %v2017_v2, %v1415_v5 }
 0x7fb   : > { %v1417_v9 = vadd.f32 %v2017_v2, %v1416_v8 }
 0x7fd   : > { %v1419_v10 = vsel %vm1418_vm3, %v2017_v2, %v1417_v9 }
 0x87b   : > { %v1375_v55 = vpop.f32.mrf.mxu2 }
 0x87c   : > { %v1379_v56 = vpack.c.bf16 %v1375_v55, %v1375_v55 }
 0x87e   : > { %1864 = vmatmul.msk.bf16.vlgmr.msrb.gmra.mxu3 %vm783_vm1, %v1379_v56 }
 0x883   : > { %v1377_v57 = vpop.f32.mrf.mxu2 }
 0x901   : > { %v1397_v59 = vpop.f32.mrf.mxu3 }
 0x902   : > { %v1401_v60 = vadd.f32 %v1397_v59, %v1219_v35 }
 0x904   : > { %v1406_v61 = vadd.f32 %v1993_v58, %v1401_v60 }
 0x906   : > { %v1407_v62 = vadd.f32 %v1406_v61, %v2282_v4  ;;  %v1920_v4 = vld [vmem:[%s2566_s13 + $0x8] sm:$0xff]  ;;  %v1998_v61 = vld [vmem:[%s2570_s17] ss:$0 sm:$0xff] }
 0x907   : > { %1477 = vmatpush.bf16.msra.mxu0 %v1920_v4 }
 0x908   : > { %v1410_v63 = vsel %vm694_vm0, %v1407_v62, 0.0 }
 0x909   : > { %1411 = vadd.xlane.f32.xlu2 %v1410_v63  ;;  %v1399_v0 = vpop.f32.mrf.mxu3 }
 0x90a   : > { %v1999_v0 = vld [vmem:[%s2606_s29] ss:$0 sm:$0xff] }
 0x90b   : > { %1478 = vmatpush.bf16.msra.mxu0 %v1919_v17 }
 0x97c   : > { %v1412_v11 = vpop.xlane.xlu2 %1411 }
 0x97d   : > { %v1420_v12 = vmul.f32 %v1419_v10, %v1412_v11 }
 0x97f   : > { %v1421_v13 = vsub.f32 %v1407_v62, %v1420_v12 }
 0x981   : > { %v1422_v15 = vmul.f32 %v1421_v13, %v1421_v13 }
 0x983   : > { %v1423_v16 = vsel %vm694_vm0, %v1422_v15, 0.0 }
 0x984   : > { %1424 = vadd.xlane.f32.xlu0 %v1423_v16 }
 0x9f7   : > { %v1425_v18 = vpop.xlane.xlu0 %1424 }
 0x9f8   : > { %v1426_v19 = vmul.f32 %v1425_v18, %v1419_v10 }
 0x9fa   : > { %v1427_v21 = vadd.f32 1e-12, %v1426_v19 }
 0x9fc   : > { %2018 = vrsqrt.f32 %v1427_v21  ;;  %vm1434_vm5 = vweird.f32 %v1427_v21 }
 0xa02   : > { %v2019_v22 = vpop.eup %2018 }
 0xa03   : > { %v1429_v24 = vmul.f32 %v2019_v22, %v1427_v21  ;;  %vm1435_vm4 = vweird.f32 %v2019_v22 }
 0xa04   : > { %vm1436_vm6 = vmor %vm1434_vm5, %vm1435_vm4 }
 0xa05   : > { %v1430_v25 = vmul.f32 %v2019_v22, %v1429_v24 }
 0xa07   : > { %v1431_v26 = vmul.f32 0.5, %v1430_v25 }
 0xa09   : > { %v1432_v27 = vsub.f32 1.5, %v1431_v26 }
 0xa0b   : > { %v1433_v28 = vmul.f32 %v2019_v22, %v1432_v27 }
 0xa0d   : > { %v1437_v30 = vsel %vm1436_vm6, %v2019_v22, %v1433_v28 }
 0xa0e   : > { %v1438_v32 = vmul.f32 %v1437_v30, %v1421_v13 }
 0xa10   : > { %v1442_v33 = vmul.f32 %v1994_v29, %v1438_v32 }
 0xa12   : > { %v1446_v34 = vadd.f32 %v1995_v31, %v1442_v33 }
 0xa14   : > { %v1447_v35 = vpack.c.bf16 %v1446_v34, %v1446_v34 }
 0xa16   : > { %1873 = vmatmul.msk.bf16.vlgmr.msra.gmra.mxu0 %vm694_vm0, %v1447_v35 }
 0xa93   : > { %v1480_v39 = vpop.f32.mrf.mxu0 }
 0xa94   : > { %v1481_v40 = vadd.f32 %v1996_v38, %v1480_v39 }
 0xa96   : > { %v1484_v41 = vmax.f32 %v1481_v40, 0.0 }
 0xa98   : > { %v1485_v42 = vpack.c.bf16 %v1484_v41, %v1484_v41 }
 0xa9a   : > { %1890 = vmatmul.msk.bf16.vlgmr.msra.gmra.mxu1 %vm1522_vm7, %v1485_v42 }
 0xa9b   : > { %v1482_v43 = vpop.f32.mrf.mxu0 }
 0xb17   : > { %v1535_v44 = vpop.f32.mrf.mxu1 }
 0xb18   : > { %v1536_v45 = vadd.f32 %v1997_v14, %v1535_v44 }
 0xb1a   : > { %v1539_v7 = vadd.f32 %v1536_v45, %v1446_v34 }
 0xb1c   : > { %v1542_v46 = vsel %vm694_vm0, %v1539_v7, 0.0 }
 0xb1d   : > { %1543 = vadd.xlane.f32.xlu1 %v1542_v46 }
 0xb1f   : > { %v1537_v47 = vpop.f32.mrf.mxu1 }
 0xb90   : > { %v1544_v23 = vpop.xlane.xlu1 %1543 }
 0xb91   : > { %v1545_v48 = vmul.f32 %v1544_v23, %v1419_v10 }
 0xb93   : > { %v1546_v49 = vsub.f32 %v1539_v7, %v1545_v48 }
 0xb95   : > { %v1547_v50 = vmul.f32 %v1546_v49, %v1546_v49 }
 0xb97   : > { %v1548_v51 = vsel %vm694_vm0, %v1547_v50, 0.0 }
 0xb98   : > { %1549 = vadd.xlane.f32.xlu2 %v1548_v51 }
 0xc0b   : > { %v1550_v52 = vpop.xlane.xlu2 %1549 }
 0xc0c   : > { %v1551_v53 = vmul.f32 %v1550_v52, %v1419_v10 }
 0xc0e   : > { %v1552_v54 = vadd.f32 1e-12, %v1551_v53 }
 0xc10   : > { %2020 = vrsqrt.f32 %v1552_v54  ;;  %vm1559_vm9 = vweird.f32 %v1552_v54 }
 0xc16   : > { %v2021_v55 = vpop.eup %2020 }
 0xc17   : > { %v1554_v56 = vmul.f32 %v2021_v55, %v1552_v54  ;;  %vm1560_vm8 = vweird.f32 %v2021_v55 }
 0xc18   : > { %vm1561_vm10 = vmor %vm1559_vm9, %vm1560_vm8 }
 0xc19   : > { %v1555_v57 = vmul.f32 %v2021_v55, %v1554_v56 }
 0xc1b   : > { %v1556_v58 = vmul.f32 0.5, %v1555_v57 }
 0xc1d   : > { %v1557_v59 = vsub.f32 1.5, %v1556_v58 }
 0xc1f   : > { %v1558_v60 = vmul.f32 %v2021_v55, %v1557_v59 }
 0xc21   : > { %v1562_v62 = vsel %vm1561_vm10, %v2021_v55, %v1558_v60 }
 0xc22   : > { %v1563_v63 = vmul.f32 %v1562_v62, %v1546_v49 }
 0xc24   : > { %v1567_v1 = vmul.f32 %v1998_v61, %v1563_v63 }
 0xc26   : > { %v1571_v2 = vadd.f32 %v1999_v0, %v1567_v1 }
 0xc28   : > { %1572 = vst.msk [vmem:[%s649_s25] sm:$0xff] %vm694_vm0, %v1571_v2 }
 0xc29   : > { %2049 = shalt.err (!%p2046_p5)
}
 0xc2a   : > { %1925 = dma.vmem_to_hbm [thread:$0]  (%p2243_p4), %s1588_s21, 128, %s1590_s4, %s1574_s23  }
 0xc2b PF: > { %s2607_s0 = sld [smem:[#allocation8_spill]] }
 0xc2c   : > { %s2608_s26 = sld [smem:[#allocation5_spill]] }
 0xc31   : > { %p1931_p6 = scmp.ge.s32.totalorder %s2607_s0, 2 }
 0xc32   : > { %s1601_s25 = sand.u32 1, %s2608_s26  }
 0xc33   : > { %p1928_p7 = pnand %p1931_p6, %p2250_p8  ;;  %s1602_s20 = scalar_lea.sflag [#allocation3], %s1601_s25 }
 0xc35   : > { %p1929_p9 = pneg %p1928_p7 }
 0xc37   : > { %2075 = dma.done.wait (%p1929_p9), %s1602_s20, 128  }
 0xc38   : > { %2077 = vsyncadd (%p1929_p9), %s1602_s20, 4294967168  ;;  %s32_s22 = sadd.s32 1, %s2607_s0   ;;  %s2610_s24 = sld [smem:[#allocation6_spill]] }
 0xc39   : > { %p29_p10 = scmp.ge.s32.totalorder %s32_s22, 4   ;;  %s2611_s20 = sld [smem:[#allocation12_spill]] }
 0xc3a   : > { %s2612_s21 = sld [smem:[#allocation7_spill]]  ;;  %s2614_s0 = smov %s2084_s30 }
 0xc3b   : > { %s2613_s1 = sld [smem:[#allocation9_spill]]  ;;  %31 = sbr.rel (!%p29_p10) target bundleno = 11 (0xb), region = 158 }
 0xc3e   : > { %s2615_s30 = smov %s2610_s24 }
 0xc40   :  { %1608 = vsyncpa [#allocation3], 1 }
 0xc41   :  { %1610 = vsyncpa [#allocation3 + $0x1], 1 }

</bundles_post_ra>
